<compile_context>
chip_gen: v6e
topology: v6e:2x2x1
jax: 0.10.0
libtpu: 0.0.40
codegen_flags: <defaults>
</compile_context>

<pallas_src>
import jax
import jax.numpy as jnp
from jax.experimental import pallas as pl
from jax.experimental.pallas import tpu as pltpu

_LANES = 128
_MAX_TILE_ROWS = 32   # 32 x 128 = 4096 batch elements per grid step


def _make_kernel(hidden_size, output_size):
    H, O = hidden_size, output_size

    def _kernel(x_ref, w1_ref, wf_ref, bf_ref, o_ref):
        # x_ref : (rows, 128)     f32 VMEM -- lane-packed batch tile
        # w1_ref: (2*H,)          f32 SMEM -- fc1.weight flattened row-major:
        #                                      [w_x2(0), w_x(0), w_x2(1), ...]
        # wf_ref: (O*H,)          f32 SMEM -- fcfinal.weight flattened row-major
        # bf_ref: (O,)            f32 SMEM -- fcfinal.bias
        # o_ref : (O, rows, 128)  f32 VMEM -- lane-dense outputs, one slab per unit
        x = x_ref[...]
        x2 = x * x

        # Fold the fcfinal bias into the accumulator init (saves O adds later).
        acc = [jnp.full_like(x, bf_ref[j]) for j in range(O)]

        for i in range(H):
            # fc1 unit i + ReLU: two broadcast-FMAs + max, all on the VPU.
            h = jnp.maximum(x2 * w1_ref[2 * i] + x * w1_ref[2 * i + 1], 0.0)
            # fcfinal contribution of hidden unit i to every output unit.
            for j in range(O):
                acc[j] = acc[j] + h * wf_ref[j * H + i]

        for j in range(O):
            o_ref[j, :, :] = acc[j]

    return _kernel


def net_for_polynomials(x, w1, wf, bf):
    """x: (B, 1); w1: (H, 2); wf: (O, H); bf: (O,)  -- PyTorch Linear layouts."""
    B = x.shape[0]
    H = w1.shape[0]
    O = wf.shape[0]

    # Lane-pack the batch: pad B up to num_tiles * tile_rows * 128.
    rows_needed = pl.cdiv(B, _LANES)
    tile_rows = min(_MAX_TILE_ROWS, max(8, pl.next_power_of_2(rows_needed)))
    num_tiles = pl.cdiv(rows_needed, tile_rows)
    rows = num_tiles * tile_rows
    b_pad = rows * _LANES

    xf = jnp.pad(jnp.reshape(x, (-1,)), (0, b_pad - B))
    x_packed = xf.reshape(rows, _LANES)

    # Flatten weights to 1-D for compact SMEM residency (avoids 2-D SMEM padding).
    w1_flat = jnp.reshape(w1, (-1,))   # (2*H,) row-major: [w_x2(i), w_x(i)]
    wf_flat = jnp.reshape(wf, (-1,))   # (O*H,) row-major

    out_packed = pl.pallas_call(
        _make_kernel(H, O),
        out_shape=jax.ShapeDtypeStruct((O, rows, _LANES), jnp.float32),
        grid=(num_tiles,),
        in_specs=[
            pl.BlockSpec((tile_rows, _LANES), lambda i: (i, 0)),
            pl.BlockSpec(memory_space=pltpu.MemorySpace.SMEM),  # w1_flat
            pl.BlockSpec(memory_space=pltpu.MemorySpace.SMEM),  # wf_flat
            pl.BlockSpec(memory_space=pltpu.MemorySpace.SMEM),  # bf
        ],
        out_specs=pl.BlockSpec((O, tile_rows, _LANES), lambda i: (0, i, 0)),
        compiler_params=pltpu.CompilerParams(
            dimension_semantics=("parallel",)),
    )(x_packed, w1_flat, wf_flat, bf)

    # (O, rows, 128) -> (O, B_pad) -> slice -> (B, O); tiny host-side transpose
    # keeps all device-side stores lane-dense.
    return out_packed.reshape(O, b_pad)[:, :B].T


if __name__ == "__main__":
    hidden_size = 32
    output_size = 4
    batch = 8

    key = jax.random.PRNGKey(0)
    k_x, k_w1, k_wf, k_bf = jax.random.split(key, 4)

    # Deterministic synthetic parameters (PyTorch Linear weight shapes).
    x = jax.random.normal(k_x, (batch, 1), dtype=jnp.float32)
    w1 = jax.random.normal(k_w1, (hidden_size, 2), dtype=jnp.float32) * 0.5            # fc1.weight
    wf = jax.random.normal(k_wf, (output_size, hidden_size), dtype=jnp.float32) * 0.5  # fcfinal.weight
    bf = jax.random.normal(k_bf, (output_size,), dtype=jnp.float32) * 0.1              # fcfinal.bias
    # TODO(synk): fc2/fc3 parameters exist in __init__ but are unused in forward; not materialized.

    fwd = jax.jit(net_for_polynomials)
    out = jax.block_until_ready(fwd(x, w1, wf, bf))

    # Cross-check against a plain-JAX reference (full-precision dots).
    xc = jnp.concatenate([x * x, x], axis=1)
    hid = jnp.maximum(jnp.dot(xc, w1.T, precision=jax.lax.Precision.HIGHEST), 0.0)
    ref = jnp.dot(hid, wf.T, precision=jax.lax.Precision.HIGHEST) + bf
    assert out.shape == (batch, output_size)
    assert jnp.allclose(out, ref, atol=1e-4, rtol=1e-5), "mismatch vs reference"

    print("KERNEL_OK")
</pallas_src>

<mosaic_0001>
module attributes {stable_mosaic.version = 11 : i64} {
  func.func @_kernel(%arg0: i32, %arg1: memref<8x128xf32, #tpu.memory_space<vmem>>, %arg2: memref<64xf32, #tpu.memory_space<smem>>, %arg3: memref<128xf32, #tpu.memory_space<smem>>, %arg4: memref<4xf32, #tpu.memory_space<smem>>, %arg5: memref<4x8x128xf32, #tpu.memory_space<vmem>>) attributes {dimension_semantics = [#tpu.dimension_semantics<parallel>], iteration_bounds = array<i64: 1>, scalar_prefetch = 0 : i64, scratch_operands = 0 : i64, tpu.core_type = #tpu.core_type<tc>, window_params = [{transform_indices = @transform_0, window_bounds = array<i64: 8, 128>}, {transform_indices = @transform_1, window_bounds = array<i64: 64>}, {transform_indices = @transform_2, window_bounds = array<i64: 128>}, {transform_indices = @transform_3, window_bounds = array<i64: 4>}, {transform_indices = @transform_4, window_bounds = array<i64: 4, 8, 128>}]} {
    %c0 = arith.constant 0 : index
    %c0_0 = arith.constant 0 : index
    %0 = vector.load %arg1[%c0, %c0_0] : memref<8x128xf32, #tpu.memory_space<vmem>>, vector<8x128xf32>
    %1 = arith.mulf %0, %0 : vector<8x128xf32>
    %c0_1 = arith.constant 0 : index
    %2 = memref.load %arg4[%c0_1] : memref<4xf32, #tpu.memory_space<smem>>
    %3 = vector.broadcast %2 : f32 to vector<8x128xf32>
    %c1 = arith.constant 1 : index
    %4 = memref.load %arg4[%c1] : memref<4xf32, #tpu.memory_space<smem>>
    %5 = vector.broadcast %4 : f32 to vector<8x128xf32>
    %c2 = arith.constant 2 : index
    %6 = memref.load %arg4[%c2] : memref<4xf32, #tpu.memory_space<smem>>
    %7 = vector.broadcast %6 : f32 to vector<8x128xf32>
    %c3 = arith.constant 3 : index
    %8 = memref.load %arg4[%c3] : memref<4xf32, #tpu.memory_space<smem>>
    %9 = vector.broadcast %8 : f32 to vector<8x128xf32>
    %c0_2 = arith.constant 0 : index
    %10 = memref.load %arg2[%c0_2] : memref<64xf32, #tpu.memory_space<smem>>
    %11 = vector.broadcast %10 : f32 to vector<8x128xf32>
    %12 = arith.mulf %1, %11 : vector<8x128xf32>
    %c1_3 = arith.constant 1 : index
    %13 = memref.load %arg2[%c1_3] : memref<64xf32, #tpu.memory_space<smem>>
    %14 = vector.broadcast %13 : f32 to vector<8x128xf32>
    %15 = arith.mulf %0, %14 : vector<8x128xf32>
    %16 = arith.addf %12, %15 : vector<8x128xf32>
    %cst = arith.constant 0.000000e+00 : f32
    %17 = vector.broadcast %cst : f32 to vector<8x128xf32>
    %18 = arith.maximumf %16, %17 : vector<8x128xf32>
    %c0_4 = arith.constant 0 : index
    %19 = memref.load %arg3[%c0_4] : memref<128xf32, #tpu.memory_space<smem>>
    %20 = vector.broadcast %19 : f32 to vector<8x128xf32>
    %21 = arith.mulf %18, %20 : vector<8x128xf32>
    %22 = arith.addf %3, %21 : vector<8x128xf32>
    %c32 = arith.constant 32 : index
    %23 = memref.load %arg3[%c32] : memref<128xf32, #tpu.memory_space<smem>>
    %24 = vector.broadcast %23 : f32 to vector<8x128xf32>
    %25 = arith.mulf %18, %24 : vector<8x128xf32>
    %26 = arith.addf %5, %25 : vector<8x128xf32>
    %c64 = arith.constant 64 : index
    %27 = memref.load %arg3[%c64] : memref<128xf32, #tpu.memory_space<smem>>
    %28 = vector.broadcast %27 : f32 to vector<8x128xf32>
    %29 = arith.mulf %18, %28 : vector<8x128xf32>
    %30 = arith.addf %7, %29 : vector<8x128xf32>
    %c96 = arith.constant 96 : index
    %31 = memref.load %arg3[%c96] : memref<128xf32, #tpu.memory_space<smem>>
    %32 = vector.broadcast %31 : f32 to vector<8x128xf32>
    %33 = arith.mulf %18, %32 : vector<8x128xf32>
    %34 = arith.addf %9, %33 : vector<8x128xf32>
    %c2_5 = arith.constant 2 : index
    %35 = memref.load %arg2[%c2_5] : memref<64xf32, #tpu.memory_space<smem>>
    %36 = vector.broadcast %35 : f32 to vector<8x128xf32>
    %37 = arith.mulf %1, %36 : vector<8x128xf32>
    %c3_6 = arith.constant 3 : index
    %38 = memref.load %arg2[%c3_6] : memref<64xf32, #tpu.memory_space<smem>>
    %39 = vector.broadcast %38 : f32 to vector<8x128xf32>
    %40 = arith.mulf %0, %39 : vector<8x128xf32>
    %41 = arith.addf %37, %40 : vector<8x128xf32>
    %cst_7 = arith.constant 0.000000e+00 : f32
    %42 = vector.broadcast %cst_7 : f32 to vector<8x128xf32>
    %43 = arith.maximumf %41, %42 : vector<8x128xf32>
    %c1_8 = arith.constant 1 : index
    %44 = memref.load %arg3[%c1_8] : memref<128xf32, #tpu.memory_space<smem>>
    %45 = vector.broadcast %44 : f32 to vector<8x128xf32>
    %46 = arith.mulf %43, %45 : vector<8x128xf32>
    %47 = arith.addf %22, %46 : vector<8x128xf32>
    %c33 = arith.constant 33 : index
    %48 = memref.load %arg3[%c33] : memref<128xf32, #tpu.memory_space<smem>>
    %49 = vector.broadcast %48 : f32 to vector<8x128xf32>
    %50 = arith.mulf %43, %49 : vector<8x128xf32>
    %51 = arith.addf %26, %50 : vector<8x128xf32>
    %c65 = arith.constant 65 : index
    %52 = memref.load %arg3[%c65] : memref<128xf32, #tpu.memory_space<smem>>
    %53 = vector.broadcast %52 : f32 to vector<8x128xf32>
    %54 = arith.mulf %43, %53 : vector<8x128xf32>
    %55 = arith.addf %30, %54 : vector<8x128xf32>
    %c97 = arith.constant 97 : index
    %56 = memref.load %arg3[%c97] : memref<128xf32, #tpu.memory_space<smem>>
    %57 = vector.broadcast %56 : f32 to vector<8x128xf32>
    %58 = arith.mulf %43, %57 : vector<8x128xf32>
    %59 = arith.addf %34, %58 : vector<8x128xf32>
    %c4 = arith.constant 4 : index
    %60 = memref.load %arg2[%c4] : memref<64xf32, #tpu.memory_space<smem>>
    %61 = vector.broadcast %60 : f32 to vector<8x128xf32>
    %62 = arith.mulf %1, %61 : vector<8x128xf32>
    %c5 = arith.constant 5 : index
    %63 = memref.load %arg2[%c5] : memref<64xf32, #tpu.memory_space<smem>>
    %64 = vector.broadcast %63 : f32 to vector<8x128xf32>
    %65 = arith.mulf %0, %64 : vector<8x128xf32>
    %66 = arith.addf %62, %65 : vector<8x128xf32>
    %cst_9 = arith.constant 0.000000e+00 : f32
    %67 = vector.broadcast %cst_9 : f32 to vector<8x128xf32>
    %68 = arith.maximumf %66, %67 : vector<8x128xf32>
    %c2_10 = arith.constant 2 : index
    %69 = memref.load %arg3[%c2_10] : memref<128xf32, #tpu.memory_space<smem>>
    %70 = vector.broadcast %69 : f32 to vector<8x128xf32>
    %71 = arith.mulf %68, %70 : vector<8x128xf32>
    %72 = arith.addf %47, %71 : vector<8x128xf32>
    %c34 = arith.constant 34 : index
    %73 = memref.load %arg3[%c34] : memref<128xf32, #tpu.memory_space<smem>>
    %74 = vector.broadcast %73 : f32 to vector<8x128xf32>
    %75 = arith.mulf %68, %74 : vector<8x128xf32>
    %76 = arith.addf %51, %75 : vector<8x128xf32>
    %c66 = arith.constant 66 : index
    %77 = memref.load %arg3[%c66] : memref<128xf32, #tpu.memory_space<smem>>
    %78 = vector.broadcast %77 : f32 to vector<8x128xf32>
    %79 = arith.mulf %68, %78 : vector<8x128xf32>
    %80 = arith.addf %55, %79 : vector<8x128xf32>
    %c98 = arith.constant 98 : index
    %81 = memref.load %arg3[%c98] : memref<128xf32, #tpu.memory_space<smem>>
    %82 = vector.broadcast %81 : f32 to vector<8x128xf32>
    %83 = arith.mulf %68, %82 : vector<8x128xf32>
    %84 = arith.addf %59, %83 : vector<8x128xf32>
    %c6 = arith.constant 6 : index
    %85 = memref.load %arg2[%c6] : memref<64xf32, #tpu.memory_space<smem>>
    %86 = vector.broadcast %85 : f32 to vector<8x128xf32>
    %87 = arith.mulf %1, %86 : vector<8x128xf32>
    %c7 = arith.constant 7 : index
    %88 = memref.load %arg2[%c7] : memref<64xf32, #tpu.memory_space<smem>>
    %89 = vector.broadcast %88 : f32 to vector<8x128xf32>
    %90 = arith.mulf %0, %89 : vector<8x128xf32>
    %91 = arith.addf %87, %90 : vector<8x128xf32>
    %cst_11 = arith.constant 0.000000e+00 : f32
    %92 = vector.broadcast %cst_11 : f32 to vector<8x128xf32>
    %93 = arith.maximumf %91, %92 : vector<8x128xf32>
    %c3_12 = arith.constant 3 : index
    %94 = memref.load %arg3[%c3_12] : memref<128xf32, #tpu.memory_space<smem>>
    %95 = vector.broadcast %94 : f32 to vector<8x128xf32>
    %96 = arith.mulf %93, %95 : vector<8x128xf32>
    %97 = arith.addf %72, %96 : vector<8x128xf32>
    %c35 = arith.constant 35 : index
    %98 = memref.load %arg3[%c35] : memref<128xf32, #tpu.memory_space<smem>>
    %99 = vector.broadcast %98 : f32 to vector<8x128xf32>
    %100 = arith.mulf %93, %99 : vector<8x128xf32>
    %101 = arith.addf %76, %100 : vector<8x128xf32>
    %c67 = arith.constant 67 : index
    %102 = memref.load %arg3[%c67] : memref<128xf32, #tpu.memory_space<smem>>
    %103 = vector.broadcast %102 : f32 to vector<8x128xf32>
    %104 = arith.mulf %93, %103 : vector<8x128xf32>
    %105 = arith.addf %80, %104 : vector<8x128xf32>
    %c99 = arith.constant 99 : index
    %106 = memref.load %arg3[%c99] : memref<128xf32, #tpu.memory_space<smem>>
    %107 = vector.broadcast %106 : f32 to vector<8x128xf32>
    %108 = arith.mulf %93, %107 : vector<8x128xf32>
    %109 = arith.addf %84, %108 : vector<8x128xf32>
    %c8 = arith.constant 8 : index
    %110 = memref.load %arg2[%c8] : memref<64xf32, #tpu.memory_space<smem>>
    %111 = vector.broadcast %110 : f32 to vector<8x128xf32>
    %112 = arith.mulf %1, %111 : vector<8x128xf32>
    %c9 = arith.constant 9 : index
    %113 = memref.load %arg2[%c9] : memref<64xf32, #tpu.memory_space<smem>>
    %114 = vector.broadcast %113 : f32 to vector<8x128xf32>
    %115 = arith.mulf %0, %114 : vector<8x128xf32>
    %116 = arith.addf %112, %115 : vector<8x128xf32>
    %cst_13 = arith.constant 0.000000e+00 : f32
    %117 = vector.broadcast %cst_13 : f32 to vector<8x128xf32>
    %118 = arith.maximumf %116, %117 : vector<8x128xf32>
    %c4_14 = arith.constant 4 : index
    %119 = memref.load %arg3[%c4_14] : memref<128xf32, #tpu.memory_space<smem>>
    %120 = vector.broadcast %119 : f32 to vector<8x128xf32>
    %121 = arith.mulf %118, %120 : vector<8x128xf32>
    %122 = arith.addf %97, %121 : vector<8x128xf32>
    %c36 = arith.constant 36 : index
    %123 = memref.load %arg3[%c36] : memref<128xf32, #tpu.memory_space<smem>>
    %124 = vector.broadcast %123 : f32 to vector<8x128xf32>
    %125 = arith.mulf %118, %124 : vector<8x128xf32>
    %126 = arith.addf %101, %125 : vector<8x128xf32>
    %c68 = arith.constant 68 : index
    %127 = memref.load %arg3[%c68] : memref<128xf32, #tpu.memory_space<smem>>
    %128 = vector.broadcast %127 : f32 to vector<8x128xf32>
    %129 = arith.mulf %118, %128 : vector<8x128xf32>
    %130 = arith.addf %105, %129 : vector<8x128xf32>
    %c100 = arith.constant 100 : index
    %131 = memref.load %arg3[%c100] : memref<128xf32, #tpu.memory_space<smem>>
    %132 = vector.broadcast %131 : f32 to vector<8x128xf32>
    %133 = arith.mulf %118, %132 : vector<8x128xf32>
    %134 = arith.addf %109, %133 : vector<8x128xf32>
    %c10 = arith.constant 10 : index
    %135 = memref.load %arg2[%c10] : memref<64xf32, #tpu.memory_space<smem>>
    %136 = vector.broadcast %135 : f32 to vector<8x128xf32>
    %137 = arith.mulf %1, %136 : vector<8x128xf32>
    %c11 = arith.constant 11 : index
    %138 = memref.load %arg2[%c11] : memref<64xf32, #tpu.memory_space<smem>>
    %139 = vector.broadcast %138 : f32 to vector<8x128xf32>
    %140 = arith.mulf %0, %139 : vector<8x128xf32>
    %141 = arith.addf %137, %140 : vector<8x128xf32>
    %cst_15 = arith.constant 0.000000e+00 : f32
    %142 = vector.broadcast %cst_15 : f32 to vector<8x128xf32>
    %143 = arith.maximumf %141, %142 : vector<8x128xf32>
    %c5_16 = arith.constant 5 : index
    %144 = memref.load %arg3[%c5_16] : memref<128xf32, #tpu.memory_space<smem>>
    %145 = vector.broadcast %144 : f32 to vector<8x128xf32>
    %146 = arith.mulf %143, %145 : vector<8x128xf32>
    %147 = arith.addf %122, %146 : vector<8x128xf32>
    %c37 = arith.constant 37 : index
    %148 = memref.load %arg3[%c37] : memref<128xf32, #tpu.memory_space<smem>>
    %149 = vector.broadcast %148 : f32 to vector<8x128xf32>
    %150 = arith.mulf %143, %149 : vector<8x128xf32>
    %151 = arith.addf %126, %150 : vector<8x128xf32>
    %c69 = arith.constant 69 : index
    %152 = memref.load %arg3[%c69] : memref<128xf32, #tpu.memory_space<smem>>
    %153 = vector.broadcast %152 : f32 to vector<8x128xf32>
    %154 = arith.mulf %143, %153 : vector<8x128xf32>
    %155 = arith.addf %130, %154 : vector<8x128xf32>
    %c101 = arith.constant 101 : index
    %156 = memref.load %arg3[%c101] : memref<128xf32, #tpu.memory_space<smem>>
    %157 = vector.broadcast %156 : f32 to vector<8x128xf32>
    %158 = arith.mulf %143, %157 : vector<8x128xf32>
    %159 = arith.addf %134, %158 : vector<8x128xf32>
    %c12 = arith.constant 12 : index
    %160 = memref.load %arg2[%c12] : memref<64xf32, #tpu.memory_space<smem>>
    %161 = vector.broadcast %160 : f32 to vector<8x128xf32>
    %162 = arith.mulf %1, %161 : vector<8x128xf32>
    %c13 = arith.constant 13 : index
    %163 = memref.load %arg2[%c13] : memref<64xf32, #tpu.memory_space<smem>>
    %164 = vector.broadcast %163 : f32 to vector<8x128xf32>
    %165 = arith.mulf %0, %164 : vector<8x128xf32>
    %166 = arith.addf %162, %165 : vector<8x128xf32>
    %cst_17 = arith.constant 0.000000e+00 : f32
    %167 = vector.broadcast %cst_17 : f32 to vector<8x128xf32>
    %168 = arith.maximumf %166, %167 : vector<8x128xf32>
    %c6_18 = arith.constant 6 : index
    %169 = memref.load %arg3[%c6_18] : memref<128xf32, #tpu.memory_space<smem>>
    %170 = vector.broadcast %169 : f32 to vector<8x128xf32>
    %171 = arith.mulf %168, %170 : vector<8x128xf32>
    %172 = arith.addf %147, %171 : vector<8x128xf32>
    %c38 = arith.constant 38 : index
    %173 = memref.load %arg3[%c38] : memref<128xf32, #tpu.memory_space<smem>>
    %174 = vector.broadcast %173 : f32 to vector<8x128xf32>
    %175 = arith.mulf %168, %174 : vector<8x128xf32>
    %176 = arith.addf %151, %175 : vector<8x128xf32>
    %c70 = arith.constant 70 : index
    %177 = memref.load %arg3[%c70] : memref<128xf32, #tpu.memory_space<smem>>
    %178 = vector.broadcast %177 : f32 to vector<8x128xf32>
    %179 = arith.mulf %168, %178 : vector<8x128xf32>
    %180 = arith.addf %155, %179 : vector<8x128xf32>
    %c102 = arith.constant 102 : index
    %181 = memref.load %arg3[%c102] : memref<128xf32, #tpu.memory_space<smem>>
    %182 = vector.broadcast %181 : f32 to vector<8x128xf32>
    %183 = arith.mulf %168, %182 : vector<8x128xf32>
    %184 = arith.addf %159, %183 : vector<8x128xf32>
    %c14 = arith.constant 14 : index
    %185 = memref.load %arg2[%c14] : memref<64xf32, #tpu.memory_space<smem>>
    %186 = vector.broadcast %185 : f32 to vector<8x128xf32>
    %187 = arith.mulf %1, %186 : vector<8x128xf32>
    %c15 = arith.constant 15 : index
    %188 = memref.load %arg2[%c15] : memref<64xf32, #tpu.memory_space<smem>>
    %189 = vector.broadcast %188 : f32 to vector<8x128xf32>
    %190 = arith.mulf %0, %189 : vector<8x128xf32>
    %191 = arith.addf %187, %190 : vector<8x128xf32>
    %cst_19 = arith.constant 0.000000e+00 : f32
    %192 = vector.broadcast %cst_19 : f32 to vector<8x128xf32>
    %193 = arith.maximumf %191, %192 : vector<8x128xf32>
    %c7_20 = arith.constant 7 : index
    %194 = memref.load %arg3[%c7_20] : memref<128xf32, #tpu.memory_space<smem>>
    %195 = vector.broadcast %194 : f32 to vector<8x128xf32>
    %196 = arith.mulf %193, %195 : vector<8x128xf32>
    %197 = arith.addf %172, %196 : vector<8x128xf32>
    %c39 = arith.constant 39 : index
    %198 = memref.load %arg3[%c39] : memref<128xf32, #tpu.memory_space<smem>>
    %199 = vector.broadcast %198 : f32 to vector<8x128xf32>
    %200 = arith.mulf %193, %199 : vector<8x128xf32>
    %201 = arith.addf %176, %200 : vector<8x128xf32>
    %c71 = arith.constant 71 : index
    %202 = memref.load %arg3[%c71] : memref<128xf32, #tpu.memory_space<smem>>
    %203 = vector.broadcast %202 : f32 to vector<8x128xf32>
    %204 = arith.mulf %193, %203 : vector<8x128xf32>
    %205 = arith.addf %180, %204 : vector<8x128xf32>
    %c103 = arith.constant 103 : index
    %206 = memref.load %arg3[%c103] : memref<128xf32, #tpu.memory_space<smem>>
    %207 = vector.broadcast %206 : f32 to vector<8x128xf32>
    %208 = arith.mulf %193, %207 : vector<8x128xf32>
    %209 = arith.addf %184, %208 : vector<8x128xf32>
    %c16 = arith.constant 16 : index
    %210 = memref.load %arg2[%c16] : memref<64xf32, #tpu.memory_space<smem>>
    %211 = vector.broadcast %210 : f32 to vector<8x128xf32>
    %212 = arith.mulf %1, %211 : vector<8x128xf32>
    %c17 = arith.constant 17 : index
    %213 = memref.load %arg2[%c17] : memref<64xf32, #tpu.memory_space<smem>>
    %214 = vector.broadcast %213 : f32 to vector<8x128xf32>
    %215 = arith.mulf %0, %214 : vector<8x128xf32>
    %216 = arith.addf %212, %215 : vector<8x128xf32>
    %cst_21 = arith.constant 0.000000e+00 : f32
    %217 = vector.broadcast %cst_21 : f32 to vector<8x128xf32>
    %218 = arith.maximumf %216, %217 : vector<8x128xf32>
    %c8_22 = arith.constant 8 : index
    %219 = memref.load %arg3[%c8_22] : memref<128xf32, #tpu.memory_space<smem>>
    %220 = vector.broadcast %219 : f32 to vector<8x128xf32>
    %221 = arith.mulf %218, %220 : vector<8x128xf32>
    %222 = arith.addf %197, %221 : vector<8x128xf32>
    %c40 = arith.constant 40 : index
    %223 = memref.load %arg3[%c40] : memref<128xf32, #tpu.memory_space<smem>>
    %224 = vector.broadcast %223 : f32 to vector<8x128xf32>
    %225 = arith.mulf %218, %224 : vector<8x128xf32>
    %226 = arith.addf %201, %225 : vector<8x128xf32>
    %c72 = arith.constant 72 : index
    %227 = memref.load %arg3[%c72] : memref<128xf32, #tpu.memory_space<smem>>
    %228 = vector.broadcast %227 : f32 to vector<8x128xf32>
    %229 = arith.mulf %218, %228 : vector<8x128xf32>
    %230 = arith.addf %205, %229 : vector<8x128xf32>
    %c104 = arith.constant 104 : index
    %231 = memref.load %arg3[%c104] : memref<128xf32, #tpu.memory_space<smem>>
    %232 = vector.broadcast %231 : f32 to vector<8x128xf32>
    %233 = arith.mulf %218, %232 : vector<8x128xf32>
    %234 = arith.addf %209, %233 : vector<8x128xf32>
    %c18 = arith.constant 18 : index
    %235 = memref.load %arg2[%c18] : memref<64xf32, #tpu.memory_space<smem>>
    %236 = vector.broadcast %235 : f32 to vector<8x128xf32>
    %237 = arith.mulf %1, %236 : vector<8x128xf32>
    %c19 = arith.constant 19 : index
    %238 = memref.load %arg2[%c19] : memref<64xf32, #tpu.memory_space<smem>>
    %239 = vector.broadcast %238 : f32 to vector<8x128xf32>
    %240 = arith.mulf %0, %239 : vector<8x128xf32>
    %241 = arith.addf %237, %240 : vector<8x128xf32>
    %cst_23 = arith.constant 0.000000e+00 : f32
    %242 = vector.broadcast %cst_23 : f32 to vector<8x128xf32>
    %243 = arith.maximumf %241, %242 : vector<8x128xf32>
    %c9_24 = arith.constant 9 : index
    %244 = memref.load %arg3[%c9_24] : memref<128xf32, #tpu.memory_space<smem>>
    %245 = vector.broadcast %244 : f32 to vector<8x128xf32>
    %246 = arith.mulf %243, %245 : vector<8x128xf32>
    %247 = arith.addf %222, %246 : vector<8x128xf32>
    %c41 = arith.constant 41 : index
    %248 = memref.load %arg3[%c41] : memref<128xf32, #tpu.memory_space<smem>>
    %249 = vector.broadcast %248 : f32 to vector<8x128xf32>
    %250 = arith.mulf %243, %249 : vector<8x128xf32>
    %251 = arith.addf %226, %250 : vector<8x128xf32>
    %c73 = arith.constant 73 : index
    %252 = memref.load %arg3[%c73] : memref<128xf32, #tpu.memory_space<smem>>
    %253 = vector.broadcast %252 : f32 to vector<8x128xf32>
    %254 = arith.mulf %243, %253 : vector<8x128xf32>
    %255 = arith.addf %230, %254 : vector<8x128xf32>
    %c105 = arith.constant 105 : index
    %256 = memref.load %arg3[%c105] : memref<128xf32, #tpu.memory_space<smem>>
    %257 = vector.broadcast %256 : f32 to vector<8x128xf32>
    %258 = arith.mulf %243, %257 : vector<8x128xf32>
    %259 = arith.addf %234, %258 : vector<8x128xf32>
    %c20 = arith.constant 20 : index
    %260 = memref.load %arg2[%c20] : memref<64xf32, #tpu.memory_space<smem>>
    %261 = vector.broadcast %260 : f32 to vector<8x128xf32>
    %262 = arith.mulf %1, %261 : vector<8x128xf32>
    %c21 = arith.constant 21 : index
    %263 = memref.load %arg2[%c21] : memref<64xf32, #tpu.memory_space<smem>>
    %264 = vector.broadcast %263 : f32 to vector<8x128xf32>
    %265 = arith.mulf %0, %264 : vector<8x128xf32>
    %266 = arith.addf %262, %265 : vector<8x128xf32>
    %cst_25 = arith.constant 0.000000e+00 : f32
    %267 = vector.broadcast %cst_25 : f32 to vector<8x128xf32>
    %268 = arith.maximumf %266, %267 : vector<8x128xf32>
    %c10_26 = arith.constant 10 : index
    %269 = memref.load %arg3[%c10_26] : memref<128xf32, #tpu.memory_space<smem>>
    %270 = vector.broadcast %269 : f32 to vector<8x128xf32>
    %271 = arith.mulf %268, %270 : vector<8x128xf32>
    %272 = arith.addf %247, %271 : vector<8x128xf32>
    %c42 = arith.constant 42 : index
    %273 = memref.load %arg3[%c42] : memref<128xf32, #tpu.memory_space<smem>>
    %274 = vector.broadcast %273 : f32 to vector<8x128xf32>
    %275 = arith.mulf %268, %274 : vector<8x128xf32>
    %276 = arith.addf %251, %275 : vector<8x128xf32>
    %c74 = arith.constant 74 : index
    %277 = memref.load %arg3[%c74] : memref<128xf32, #tpu.memory_space<smem>>
    %278 = vector.broadcast %277 : f32 to vector<8x128xf32>
    %279 = arith.mulf %268, %278 : vector<8x128xf32>
    %280 = arith.addf %255, %279 : vector<8x128xf32>
    %c106 = arith.constant 106 : index
    %281 = memref.load %arg3[%c106] : memref<128xf32, #tpu.memory_space<smem>>
    %282 = vector.broadcast %281 : f32 to vector<8x128xf32>
    %283 = arith.mulf %268, %282 : vector<8x128xf32>
    %284 = arith.addf %259, %283 : vector<8x128xf32>
    %c22 = arith.constant 22 : index
    %285 = memref.load %arg2[%c22] : memref<64xf32, #tpu.memory_space<smem>>
    %286 = vector.broadcast %285 : f32 to vector<8x128xf32>
    %287 = arith.mulf %1, %286 : vector<8x128xf32>
    %c23 = arith.constant 23 : index
    %288 = memref.load %arg2[%c23] : memref<64xf32, #tpu.memory_space<smem>>
    %289 = vector.broadcast %288 : f32 to vector<8x128xf32>
    %290 = arith.mulf %0, %289 : vector<8x128xf32>
    %291 = arith.addf %287, %290 : vector<8x128xf32>
    %cst_27 = arith.constant 0.000000e+00 : f32
    %292 = vector.broadcast %cst_27 : f32 to vector<8x128xf32>
    %293 = arith.maximumf %291, %292 : vector<8x128xf32>
    %c11_28 = arith.constant 11 : index
    %294 = memref.load %arg3[%c11_28] : memref<128xf32, #tpu.memory_space<smem>>
    %295 = vector.broadcast %294 : f32 to vector<8x128xf32>
    %296 = arith.mulf %293, %295 : vector<8x128xf32>
    %297 = arith.addf %272, %296 : vector<8x128xf32>
    %c43 = arith.constant 43 : index
    %298 = memref.load %arg3[%c43] : memref<128xf32, #tpu.memory_space<smem>>
    %299 = vector.broadcast %298 : f32 to vector<8x128xf32>
    %300 = arith.mulf %293, %299 : vector<8x128xf32>
    %301 = arith.addf %276, %300 : vector<8x128xf32>
    %c75 = arith.constant 75 : index
    %302 = memref.load %arg3[%c75] : memref<128xf32, #tpu.memory_space<smem>>
    %303 = vector.broadcast %302 : f32 to vector<8x128xf32>
    %304 = arith.mulf %293, %303 : vector<8x128xf32>
    %305 = arith.addf %280, %304 : vector<8x128xf32>
    %c107 = arith.constant 107 : index
    %306 = memref.load %arg3[%c107] : memref<128xf32, #tpu.memory_space<smem>>
    %307 = vector.broadcast %306 : f32 to vector<8x128xf32>
    %308 = arith.mulf %293, %307 : vector<8x128xf32>
    %309 = arith.addf %284, %308 : vector<8x128xf32>
    %c24 = arith.constant 24 : index
    %310 = memref.load %arg2[%c24] : memref<64xf32, #tpu.memory_space<smem>>
    %311 = vector.broadcast %310 : f32 to vector<8x128xf32>
    %312 = arith.mulf %1, %311 : vector<8x128xf32>
    %c25 = arith.constant 25 : index
    %313 = memref.load %arg2[%c25] : memref<64xf32, #tpu.memory_space<smem>>
    %314 = vector.broadcast %313 : f32 to vector<8x128xf32>
    %315 = arith.mulf %0, %314 : vector<8x128xf32>
    %316 = arith.addf %312, %315 : vector<8x128xf32>
    %cst_29 = arith.constant 0.000000e+00 : f32
    %317 = vector.broadcast %cst_29 : f32 to vector<8x128xf32>
    %318 = arith.maximumf %316, %317 : vector<8x128xf32>
    %c12_30 = arith.constant 12 : index
    %319 = memref.load %arg3[%c12_30] : memref<128xf32, #tpu.memory_space<smem>>
    %320 = vector.broadcast %319 : f32 to vector<8x128xf32>
    %321 = arith.mulf %318, %320 : vector<8x128xf32>
    %322 = arith.addf %297, %321 : vector<8x128xf32>
    %c44 = arith.constant 44 : index
    %323 = memref.load %arg3[%c44] : memref<128xf32, #tpu.memory_space<smem>>
    %324 = vector.broadcast %323 : f32 to vector<8x128xf32>
    %325 = arith.mulf %318, %324 : vector<8x128xf32>
    %326 = arith.addf %301, %325 : vector<8x128xf32>
    %c76 = arith.constant 76 : index
    %327 = memref.load %arg3[%c76] : memref<128xf32, #tpu.memory_space<smem>>
    %328 = vector.broadcast %327 : f32 to vector<8x128xf32>
    %329 = arith.mulf %318, %328 : vector<8x128xf32>
    %330 = arith.addf %305, %329 : vector<8x128xf32>
    %c108 = arith.constant 108 : index
    %331 = memref.load %arg3[%c108] : memref<128xf32, #tpu.memory_space<smem>>
    %332 = vector.broadcast %331 : f32 to vector<8x128xf32>
    %333 = arith.mulf %318, %332 : vector<8x128xf32>
    %334 = arith.addf %309, %333 : vector<8x128xf32>
    %c26 = arith.constant 26 : index
    %335 = memref.load %arg2[%c26] : memref<64xf32, #tpu.memory_space<smem>>
    %336 = vector.broadcast %335 : f32 to vector<8x128xf32>
    %337 = arith.mulf %1, %336 : vector<8x128xf32>
    %c27 = arith.constant 27 : index
    %338 = memref.load %arg2[%c27] : memref<64xf32, #tpu.memory_space<smem>>
    %339 = vector.broadcast %338 : f32 to vector<8x128xf32>
    %340 = arith.mulf %0, %339 : vector<8x128xf32>
    %341 = arith.addf %337, %340 : vector<8x128xf32>
    %cst_31 = arith.constant 0.000000e+00 : f32
    %342 = vector.broadcast %cst_31 : f32 to vector<8x128xf32>
    %343 = arith.maximumf %341, %342 : vector<8x128xf32>
    %c13_32 = arith.constant 13 : index
    %344 = memref.load %arg3[%c13_32] : memref<128xf32, #tpu.memory_space<smem>>
    %345 = vector.broadcast %344 : f32 to vector<8x128xf32>
    %346 = arith.mulf %343, %345 : vector<8x128xf32>
    %347 = arith.addf %322, %346 : vector<8x128xf32>
    %c45 = arith.constant 45 : index
    %348 = memref.load %arg3[%c45] : memref<128xf32, #tpu.memory_space<smem>>
    %349 = vector.broadcast %348 : f32 to vector<8x128xf32>
    %350 = arith.mulf %343, %349 : vector<8x128xf32>
    %351 = arith.addf %326, %350 : vector<8x128xf32>
    %c77 = arith.constant 77 : index
    %352 = memref.load %arg3[%c77] : memref<128xf32, #tpu.memory_space<smem>>
    %353 = vector.broadcast %352 : f32 to vector<8x128xf32>
    %354 = arith.mulf %343, %353 : vector<8x128xf32>
    %355 = arith.addf %330, %354 : vector<8x128xf32>
    %c109 = arith.constant 109 : index
    %356 = memref.load %arg3[%c109] : memref<128xf32, #tpu.memory_space<smem>>
    %357 = vector.broadcast %356 : f32 to vector<8x128xf32>
    %358 = arith.mulf %343, %357 : vector<8x128xf32>
    %359 = arith.addf %334, %358 : vector<8x128xf32>
    %c28 = arith.constant 28 : index
    %360 = memref.load %arg2[%c28] : memref<64xf32, #tpu.memory_space<smem>>
    %361 = vector.broadcast %360 : f32 to vector<8x128xf32>
    %362 = arith.mulf %1, %361 : vector<8x128xf32>
    %c29 = arith.constant 29 : index
    %363 = memref.load %arg2[%c29] : memref<64xf32, #tpu.memory_space<smem>>
    %364 = vector.broadcast %363 : f32 to vector<8x128xf32>
    %365 = arith.mulf %0, %364 : vector<8x128xf32>
    %366 = arith.addf %362, %365 : vector<8x128xf32>
    %cst_33 = arith.constant 0.000000e+00 : f32
    %367 = vector.broadcast %cst_33 : f32 to vector<8x128xf32>
    %368 = arith.maximumf %366, %367 : vector<8x128xf32>
    %c14_34 = arith.constant 14 : index
    %369 = memref.load %arg3[%c14_34] : memref<128xf32, #tpu.memory_space<smem>>
    %370 = vector.broadcast %369 : f32 to vector<8x128xf32>
    %371 = arith.mulf %368, %370 : vector<8x128xf32>
    %372 = arith.addf %347, %371 : vector<8x128xf32>
    %c46 = arith.constant 46 : index
    %373 = memref.load %arg3[%c46] : memref<128xf32, #tpu.memory_space<smem>>
    %374 = vector.broadcast %373 : f32 to vector<8x128xf32>
    %375 = arith.mulf %368, %374 : vector<8x128xf32>
    %376 = arith.addf %351, %375 : vector<8x128xf32>
    %c78 = arith.constant 78 : index
    %377 = memref.load %arg3[%c78] : memref<128xf32, #tpu.memory_space<smem>>
    %378 = vector.broadcast %377 : f32 to vector<8x128xf32>
    %379 = arith.mulf %368, %378 : vector<8x128xf32>
    %380 = arith.addf %355, %379 : vector<8x128xf32>
    %c110 = arith.constant 110 : index
    %381 = memref.load %arg3[%c110] : memref<128xf32, #tpu.memory_space<smem>>
    %382 = vector.broadcast %381 : f32 to vector<8x128xf32>
    %383 = arith.mulf %368, %382 : vector<8x128xf32>
    %384 = arith.addf %359, %383 : vector<8x128xf32>
    %c30 = arith.constant 30 : index
    %385 = memref.load %arg2[%c30] : memref<64xf32, #tpu.memory_space<smem>>
    %386 = vector.broadcast %385 : f32 to vector<8x128xf32>
    %387 = arith.mulf %1, %386 : vector<8x128xf32>
    %c31 = arith.constant 31 : index
    %388 = memref.load %arg2[%c31] : memref<64xf32, #tpu.memory_space<smem>>
    %389 = vector.broadcast %388 : f32 to vector<8x128xf32>
    %390 = arith.mulf %0, %389 : vector<8x128xf32>
    %391 = arith.addf %387, %390 : vector<8x128xf32>
    %cst_35 = arith.constant 0.000000e+00 : f32
    %392 = vector.broadcast %cst_35 : f32 to vector<8x128xf32>
    %393 = arith.maximumf %391, %392 : vector<8x128xf32>
    %c15_36 = arith.constant 15 : index
    %394 = memref.load %arg3[%c15_36] : memref<128xf32, #tpu.memory_space<smem>>
    %395 = vector.broadcast %394 : f32 to vector<8x128xf32>
    %396 = arith.mulf %393, %395 : vector<8x128xf32>
    %397 = arith.addf %372, %396 : vector<8x128xf32>
    %c47 = arith.constant 47 : index
    %398 = memref.load %arg3[%c47] : memref<128xf32, #tpu.memory_space<smem>>
    %399 = vector.broadcast %398 : f32 to vector<8x128xf32>
    %400 = arith.mulf %393, %399 : vector<8x128xf32>
    %401 = arith.addf %376, %400 : vector<8x128xf32>
    %c79 = arith.constant 79 : index
    %402 = memref.load %arg3[%c79] : memref<128xf32, #tpu.memory_space<smem>>
    %403 = vector.broadcast %402 : f32 to vector<8x128xf32>
    %404 = arith.mulf %393, %403 : vector<8x128xf32>
    %405 = arith.addf %380, %404 : vector<8x128xf32>
    %c111 = arith.constant 111 : index
    %406 = memref.load %arg3[%c111] : memref<128xf32, #tpu.memory_space<smem>>
    %407 = vector.broadcast %406 : f32 to vector<8x128xf32>
    %408 = arith.mulf %393, %407 : vector<8x128xf32>
    %409 = arith.addf %384, %408 : vector<8x128xf32>
    %c32_37 = arith.constant 32 : index
    %410 = memref.load %arg2[%c32_37] : memref<64xf32, #tpu.memory_space<smem>>
    %411 = vector.broadcast %410 : f32 to vector<8x128xf32>
    %412 = arith.mulf %1, %411 : vector<8x128xf32>
    %c33_38 = arith.constant 33 : index
    %413 = memref.load %arg2[%c33_38] : memref<64xf32, #tpu.memory_space<smem>>
    %414 = vector.broadcast %413 : f32 to vector<8x128xf32>
    %415 = arith.mulf %0, %414 : vector<8x128xf32>
    %416 = arith.addf %412, %415 : vector<8x128xf32>
    %cst_39 = arith.constant 0.000000e+00 : f32
    %417 = vector.broadcast %cst_39 : f32 to vector<8x128xf32>
    %418 = arith.maximumf %416, %417 : vector<8x128xf32>
    %c16_40 = arith.constant 16 : index
    %419 = memref.load %arg3[%c16_40] : memref<128xf32, #tpu.memory_space<smem>>
    %420 = vector.broadcast %419 : f32 to vector<8x128xf32>
    %421 = arith.mulf %418, %420 : vector<8x128xf32>
    %422 = arith.addf %397, %421 : vector<8x128xf32>
    %c48 = arith.constant 48 : index
    %423 = memref.load %arg3[%c48] : memref<128xf32, #tpu.memory_space<smem>>
    %424 = vector.broadcast %423 : f32 to vector<8x128xf32>
    %425 = arith.mulf %418, %424 : vector<8x128xf32>
    %426 = arith.addf %401, %425 : vector<8x128xf32>
    %c80 = arith.constant 80 : index
    %427 = memref.load %arg3[%c80] : memref<128xf32, #tpu.memory_space<smem>>
    %428 = vector.broadcast %427 : f32 to vector<8x128xf32>
    %429 = arith.mulf %418, %428 : vector<8x128xf32>
    %430 = arith.addf %405, %429 : vector<8x128xf32>
    %c112 = arith.constant 112 : index
    %431 = memref.load %arg3[%c112] : memref<128xf32, #tpu.memory_space<smem>>
    %432 = vector.broadcast %431 : f32 to vector<8x128xf32>
    %433 = arith.mulf %418, %432 : vector<8x128xf32>
    %434 = arith.addf %409, %433 : vector<8x128xf32>
    %c34_41 = arith.constant 34 : index
    %435 = memref.load %arg2[%c34_41] : memref<64xf32, #tpu.memory_space<smem>>
    %436 = vector.broadcast %435 : f32 to vector<8x128xf32>
    %437 = arith.mulf %1, %436 : vector<8x128xf32>
    %c35_42 = arith.constant 35 : index
    %438 = memref.load %arg2[%c35_42] : memref<64xf32, #tpu.memory_space<smem>>
    %439 = vector.broadcast %438 : f32 to vector<8x128xf32>
    %440 = arith.mulf %0, %439 : vector<8x128xf32>
    %441 = arith.addf %437, %440 : vector<8x128xf32>
    %cst_43 = arith.constant 0.000000e+00 : f32
    %442 = vector.broadcast %cst_43 : f32 to vector<8x128xf32>
    %443 = arith.maximumf %441, %442 : vector<8x128xf32>
    %c17_44 = arith.constant 17 : index
    %444 = memref.load %arg3[%c17_44] : memref<128xf32, #tpu.memory_space<smem>>
    %445 = vector.broadcast %444 : f32 to vector<8x128xf32>
    %446 = arith.mulf %443, %445 : vector<8x128xf32>
    %447 = arith.addf %422, %446 : vector<8x128xf32>
    %c49 = arith.constant 49 : index
    %448 = memref.load %arg3[%c49] : memref<128xf32, #tpu.memory_space<smem>>
    %449 = vector.broadcast %448 : f32 to vector<8x128xf32>
    %450 = arith.mulf %443, %449 : vector<8x128xf32>
    %451 = arith.addf %426, %450 : vector<8x128xf32>
    %c81 = arith.constant 81 : index
    %452 = memref.load %arg3[%c81] : memref<128xf32, #tpu.memory_space<smem>>
    %453 = vector.broadcast %452 : f32 to vector<8x128xf32>
    %454 = arith.mulf %443, %453 : vector<8x128xf32>
    %455 = arith.addf %430, %454 : vector<8x128xf32>
    %c113 = arith.constant 113 : index
    %456 = memref.load %arg3[%c113] : memref<128xf32, #tpu.memory_space<smem>>
    %457 = vector.broadcast %456 : f32 to vector<8x128xf32>
    %458 = arith.mulf %443, %457 : vector<8x128xf32>
    %459 = arith.addf %434, %458 : vector<8x128xf32>
    %c36_45 = arith.constant 36 : index
    %460 = memref.load %arg2[%c36_45] : memref<64xf32, #tpu.memory_space<smem>>
    %461 = vector.broadcast %460 : f32 to vector<8x128xf32>
    %462 = arith.mulf %1, %461 : vector<8x128xf32>
    %c37_46 = arith.constant 37 : index
    %463 = memref.load %arg2[%c37_46] : memref<64xf32, #tpu.memory_space<smem>>
    %464 = vector.broadcast %463 : f32 to vector<8x128xf32>
    %465 = arith.mulf %0, %464 : vector<8x128xf32>
    %466 = arith.addf %462, %465 : vector<8x128xf32>
    %cst_47 = arith.constant 0.000000e+00 : f32
    %467 = vector.broadcast %cst_47 : f32 to vector<8x128xf32>
    %468 = arith.maximumf %466, %467 : vector<8x128xf32>
    %c18_48 = arith.constant 18 : index
    %469 = memref.load %arg3[%c18_48] : memref<128xf32, #tpu.memory_space<smem>>
    %470 = vector.broadcast %469 : f32 to vector<8x128xf32>
    %471 = arith.mulf %468, %470 : vector<8x128xf32>
    %472 = arith.addf %447, %471 : vector<8x128xf32>
    %c50 = arith.constant 50 : index
    %473 = memref.load %arg3[%c50] : memref<128xf32, #tpu.memory_space<smem>>
    %474 = vector.broadcast %473 : f32 to vector<8x128xf32>
    %475 = arith.mulf %468, %474 : vector<8x128xf32>
    %476 = arith.addf %451, %475 : vector<8x128xf32>
    %c82 = arith.constant 82 : index
    %477 = memref.load %arg3[%c82] : memref<128xf32, #tpu.memory_space<smem>>
    %478 = vector.broadcast %477 : f32 to vector<8x128xf32>
    %479 = arith.mulf %468, %478 : vector<8x128xf32>
    %480 = arith.addf %455, %479 : vector<8x128xf32>
    %c114 = arith.constant 114 : index
    %481 = memref.load %arg3[%c114] : memref<128xf32, #tpu.memory_space<smem>>
    %482 = vector.broadcast %481 : f32 to vector<8x128xf32>
    %483 = arith.mulf %468, %482 : vector<8x128xf32>
    %484 = arith.addf %459, %483 : vector<8x128xf32>
    %c38_49 = arith.constant 38 : index
    %485 = memref.load %arg2[%c38_49] : memref<64xf32, #tpu.memory_space<smem>>
    %486 = vector.broadcast %485 : f32 to vector<8x128xf32>
    %487 = arith.mulf %1, %486 : vector<8x128xf32>
    %c39_50 = arith.constant 39 : index
    %488 = memref.load %arg2[%c39_50] : memref<64xf32, #tpu.memory_space<smem>>
    %489 = vector.broadcast %488 : f32 to vector<8x128xf32>
    %490 = arith.mulf %0, %489 : vector<8x128xf32>
    %491 = arith.addf %487, %490 : vector<8x128xf32>
    %cst_51 = arith.constant 0.000000e+00 : f32
    %492 = vector.broadcast %cst_51 : f32 to vector<8x128xf32>
    %493 = arith.maximumf %491, %492 : vector<8x128xf32>
    %c19_52 = arith.constant 19 : index
    %494 = memref.load %arg3[%c19_52] : memref<128xf32, #tpu.memory_space<smem>>
    %495 = vector.broadcast %494 : f32 to vector<8x128xf32>
    %496 = arith.mulf %493, %495 : vector<8x128xf32>
    %497 = arith.addf %472, %496 : vector<8x128xf32>
    %c51 = arith.constant 51 : index
    %498 = memref.load %arg3[%c51] : memref<128xf32, #tpu.memory_space<smem>>
    %499 = vector.broadcast %498 : f32 to vector<8x128xf32>
    %500 = arith.mulf %493, %499 : vector<8x128xf32>
    %501 = arith.addf %476, %500 : vector<8x128xf32>
    %c83 = arith.constant 83 : index
    %502 = memref.load %arg3[%c83] : memref<128xf32, #tpu.memory_space<smem>>
    %503 = vector.broadcast %502 : f32 to vector<8x128xf32>
    %504 = arith.mulf %493, %503 : vector<8x128xf32>
    %505 = arith.addf %480, %504 : vector<8x128xf32>
    %c115 = arith.constant 115 : index
    %506 = memref.load %arg3[%c115] : memref<128xf32, #tpu.memory_space<smem>>
    %507 = vector.broadcast %506 : f32 to vector<8x128xf32>
    %508 = arith.mulf %493, %507 : vector<8x128xf32>
    %509 = arith.addf %484, %508 : vector<8x128xf32>
    %c40_53 = arith.constant 40 : index
    %510 = memref.load %arg2[%c40_53] : memref<64xf32, #tpu.memory_space<smem>>
    %511 = vector.broadcast %510 : f32 to vector<8x128xf32>
    %512 = arith.mulf %1, %511 : vector<8x128xf32>
    %c41_54 = arith.constant 41 : index
    %513 = memref.load %arg2[%c41_54] : memref<64xf32, #tpu.memory_space<smem>>
    %514 = vector.broadcast %513 : f32 to vector<8x128xf32>
    %515 = arith.mulf %0, %514 : vector<8x128xf32>
    %516 = arith.addf %512, %515 : vector<8x128xf32>
    %cst_55 = arith.constant 0.000000e+00 : f32
    %517 = vector.broadcast %cst_55 : f32 to vector<8x128xf32>
    %518 = arith.maximumf %516, %517 : vector<8x128xf32>
    %c20_56 = arith.constant 20 : index
    %519 = memref.load %arg3[%c20_56] : memref<128xf32, #tpu.memory_space<smem>>
    %520 = vector.broadcast %519 : f32 to vector<8x128xf32>
    %521 = arith.mulf %518, %520 : vector<8x128xf32>
    %522 = arith.addf %497, %521 : vector<8x128xf32>
    %c52 = arith.constant 52 : index
    %523 = memref.load %arg3[%c52] : memref<128xf32, #tpu.memory_space<smem>>
    %524 = vector.broadcast %523 : f32 to vector<8x128xf32>
    %525 = arith.mulf %518, %524 : vector<8x128xf32>
    %526 = arith.addf %501, %525 : vector<8x128xf32>
    %c84 = arith.constant 84 : index
    %527 = memref.load %arg3[%c84] : memref<128xf32, #tpu.memory_space<smem>>
    %528 = vector.broadcast %527 : f32 to vector<8x128xf32>
    %529 = arith.mulf %518, %528 : vector<8x128xf32>
    %530 = arith.addf %505, %529 : vector<8x128xf32>
    %c116 = arith.constant 116 : index
    %531 = memref.load %arg3[%c116] : memref<128xf32, #tpu.memory_space<smem>>
    %532 = vector.broadcast %531 : f32 to vector<8x128xf32>
    %533 = arith.mulf %518, %532 : vector<8x128xf32>
    %534 = arith.addf %509, %533 : vector<8x128xf32>
    %c42_57 = arith.constant 42 : index
    %535 = memref.load %arg2[%c42_57] : memref<64xf32, #tpu.memory_space<smem>>
    %536 = vector.broadcast %535 : f32 to vector<8x128xf32>
    %537 = arith.mulf %1, %536 : vector<8x128xf32>
    %c43_58 = arith.constant 43 : index
    %538 = memref.load %arg2[%c43_58] : memref<64xf32, #tpu.memory_space<smem>>
    %539 = vector.broadcast %538 : f32 to vector<8x128xf32>
    %540 = arith.mulf %0, %539 : vector<8x128xf32>
    %541 = arith.addf %537, %540 : vector<8x128xf32>
    %cst_59 = arith.constant 0.000000e+00 : f32
    %542 = vector.broadcast %cst_59 : f32 to vector<8x128xf32>
    %543 = arith.maximumf %541, %542 : vector<8x128xf32>
    %c21_60 = arith.constant 21 : index
    %544 = memref.load %arg3[%c21_60] : memref<128xf32, #tpu.memory_space<smem>>
    %545 = vector.broadcast %544 : f32 to vector<8x128xf32>
    %546 = arith.mulf %543, %545 : vector<8x128xf32>
    %547 = arith.addf %522, %546 : vector<8x128xf32>
    %c53 = arith.constant 53 : index
    %548 = memref.load %arg3[%c53] : memref<128xf32, #tpu.memory_space<smem>>
    %549 = vector.broadcast %548 : f32 to vector<8x128xf32>
    %550 = arith.mulf %543, %549 : vector<8x128xf32>
    %551 = arith.addf %526, %550 : vector<8x128xf32>
    %c85 = arith.constant 85 : index
    %552 = memref.load %arg3[%c85] : memref<128xf32, #tpu.memory_space<smem>>
    %553 = vector.broadcast %552 : f32 to vector<8x128xf32>
    %554 = arith.mulf %543, %553 : vector<8x128xf32>
    %555 = arith.addf %530, %554 : vector<8x128xf32>
    %c117 = arith.constant 117 : index
    %556 = memref.load %arg3[%c117] : memref<128xf32, #tpu.memory_space<smem>>
    %557 = vector.broadcast %556 : f32 to vector<8x128xf32>
    %558 = arith.mulf %543, %557 : vector<8x128xf32>
    %559 = arith.addf %534, %558 : vector<8x128xf32>
    %c44_61 = arith.constant 44 : index
    %560 = memref.load %arg2[%c44_61] : memref<64xf32, #tpu.memory_space<smem>>
    %561 = vector.broadcast %560 : f32 to vector<8x128xf32>
    %562 = arith.mulf %1, %561 : vector<8x128xf32>
    %c45_62 = arith.constant 45 : index
    %563 = memref.load %arg2[%c45_62] : memref<64xf32, #tpu.memory_space<smem>>
    %564 = vector.broadcast %563 : f32 to vector<8x128xf32>
    %565 = arith.mulf %0, %564 : vector<8x128xf32>
    %566 = arith.addf %562, %565 : vector<8x128xf32>
    %cst_63 = arith.constant 0.000000e+00 : f32
    %567 = vector.broadcast %cst_63 : f32 to vector<8x128xf32>
    %568 = arith.maximumf %566, %567 : vector<8x128xf32>
    %c22_64 = arith.constant 22 : index
    %569 = memref.load %arg3[%c22_64] : memref<128xf32, #tpu.memory_space<smem>>
    %570 = vector.broadcast %569 : f32 to vector<8x128xf32>
    %571 = arith.mulf %568, %570 : vector<8x128xf32>
    %572 = arith.addf %547, %571 : vector<8x128xf32>
    %c54 = arith.constant 54 : index
    %573 = memref.load %arg3[%c54] : memref<128xf32, #tpu.memory_space<smem>>
    %574 = vector.broadcast %573 : f32 to vector<8x128xf32>
    %575 = arith.mulf %568, %574 : vector<8x128xf32>
    %576 = arith.addf %551, %575 : vector<8x128xf32>
    %c86 = arith.constant 86 : index
    %577 = memref.load %arg3[%c86] : memref<128xf32, #tpu.memory_space<smem>>
    %578 = vector.broadcast %577 : f32 to vector<8x128xf32>
    %579 = arith.mulf %568, %578 : vector<8x128xf32>
    %580 = arith.addf %555, %579 : vector<8x128xf32>
    %c118 = arith.constant 118 : index
    %581 = memref.load %arg3[%c118] : memref<128xf32, #tpu.memory_space<smem>>
    %582 = vector.broadcast %581 : f32 to vector<8x128xf32>
    %583 = arith.mulf %568, %582 : vector<8x128xf32>
    %584 = arith.addf %559, %583 : vector<8x128xf32>
    %c46_65 = arith.constant 46 : index
    %585 = memref.load %arg2[%c46_65] : memref<64xf32, #tpu.memory_space<smem>>
    %586 = vector.broadcast %585 : f32 to vector<8x128xf32>
    %587 = arith.mulf %1, %586 : vector<8x128xf32>
    %c47_66 = arith.constant 47 : index
    %588 = memref.load %arg2[%c47_66] : memref<64xf32, #tpu.memory_space<smem>>
    %589 = vector.broadcast %588 : f32 to vector<8x128xf32>
    %590 = arith.mulf %0, %589 : vector<8x128xf32>
    %591 = arith.addf %587, %590 : vector<8x128xf32>
    %cst_67 = arith.constant 0.000000e+00 : f32
    %592 = vector.broadcast %cst_67 : f32 to vector<8x128xf32>
    %593 = arith.maximumf %591, %592 : vector<8x128xf32>
    %c23_68 = arith.constant 23 : index
    %594 = memref.load %arg3[%c23_68] : memref<128xf32, #tpu.memory_space<smem>>
    %595 = vector.broadcast %594 : f32 to vector<8x128xf32>
    %596 = arith.mulf %593, %595 : vector<8x128xf32>
    %597 = arith.addf %572, %596 : vector<8x128xf32>
    %c55 = arith.constant 55 : index
    %598 = memref.load %arg3[%c55] : memref<128xf32, #tpu.memory_space<smem>>
    %599 = vector.broadcast %598 : f32 to vector<8x128xf32>
    %600 = arith.mulf %593, %599 : vector<8x128xf32>
    %601 = arith.addf %576, %600 : vector<8x128xf32>
    %c87 = arith.constant 87 : index
    %602 = memref.load %arg3[%c87] : memref<128xf32, #tpu.memory_space<smem>>
    %603 = vector.broadcast %602 : f32 to vector<8x128xf32>
    %604 = arith.mulf %593, %603 : vector<8x128xf32>
    %605 = arith.addf %580, %604 : vector<8x128xf32>
    %c119 = arith.constant 119 : index
    %606 = memref.load %arg3[%c119] : memref<128xf32, #tpu.memory_space<smem>>
    %607 = vector.broadcast %606 : f32 to vector<8x128xf32>
    %608 = arith.mulf %593, %607 : vector<8x128xf32>
    %609 = arith.addf %584, %608 : vector<8x128xf32>
    %c48_69 = arith.constant 48 : index
    %610 = memref.load %arg2[%c48_69] : memref<64xf32, #tpu.memory_space<smem>>
    %611 = vector.broadcast %610 : f32 to vector<8x128xf32>
    %612 = arith.mulf %1, %611 : vector<8x128xf32>
    %c49_70 = arith.constant 49 : index
    %613 = memref.load %arg2[%c49_70] : memref<64xf32, #tpu.memory_space<smem>>
    %614 = vector.broadcast %613 : f32 to vector<8x128xf32>
    %615 = arith.mulf %0, %614 : vector<8x128xf32>
    %616 = arith.addf %612, %615 : vector<8x128xf32>
    %cst_71 = arith.constant 0.000000e+00 : f32
    %617 = vector.broadcast %cst_71 : f32 to vector<8x128xf32>
    %618 = arith.maximumf %616, %617 : vector<8x128xf32>
    %c24_72 = arith.constant 24 : index
    %619 = memref.load %arg3[%c24_72] : memref<128xf32, #tpu.memory_space<smem>>
    %620 = vector.broadcast %619 : f32 to vector<8x128xf32>
    %621 = arith.mulf %618, %620 : vector<8x128xf32>
    %622 = arith.addf %597, %621 : vector<8x128xf32>
    %c56 = arith.constant 56 : index
    %623 = memref.load %arg3[%c56] : memref<128xf32, #tpu.memory_space<smem>>
    %624 = vector.broadcast %623 : f32 to vector<8x128xf32>
    %625 = arith.mulf %618, %624 : vector<8x128xf32>
    %626 = arith.addf %601, %625 : vector<8x128xf32>
    %c88 = arith.constant 88 : index
    %627 = memref.load %arg3[%c88] : memref<128xf32, #tpu.memory_space<smem>>
    %628 = vector.broadcast %627 : f32 to vector<8x128xf32>
    %629 = arith.mulf %618, %628 : vector<8x128xf32>
    %630 = arith.addf %605, %629 : vector<8x128xf32>
    %c120 = arith.constant 120 : index
    %631 = memref.load %arg3[%c120] : memref<128xf32, #tpu.memory_space<smem>>
    %632 = vector.broadcast %631 : f32 to vector<8x128xf32>
    %633 = arith.mulf %618, %632 : vector<8x128xf32>
    %634 = arith.addf %609, %633 : vector<8x128xf32>
    %c50_73 = arith.constant 50 : index
    %635 = memref.load %arg2[%c50_73] : memref<64xf32, #tpu.memory_space<smem>>
    %636 = vector.broadcast %635 : f32 to vector<8x128xf32>
    %637 = arith.mulf %1, %636 : vector<8x128xf32>
    %c51_74 = arith.constant 51 : index
    %638 = memref.load %arg2[%c51_74] : memref<64xf32, #tpu.memory_space<smem>>
    %639 = vector.broadcast %638 : f32 to vector<8x128xf32>
    %640 = arith.mulf %0, %639 : vector<8x128xf32>
    %641 = arith.addf %637, %640 : vector<8x128xf32>
    %cst_75 = arith.constant 0.000000e+00 : f32
    %642 = vector.broadcast %cst_75 : f32 to vector<8x128xf32>
    %643 = arith.maximumf %641, %642 : vector<8x128xf32>
    %c25_76 = arith.constant 25 : index
    %644 = memref.load %arg3[%c25_76] : memref<128xf32, #tpu.memory_space<smem>>
    %645 = vector.broadcast %644 : f32 to vector<8x128xf32>
    %646 = arith.mulf %643, %645 : vector<8x128xf32>
    %647 = arith.addf %622, %646 : vector<8x128xf32>
    %c57 = arith.constant 57 : index
    %648 = memref.load %arg3[%c57] : memref<128xf32, #tpu.memory_space<smem>>
    %649 = vector.broadcast %648 : f32 to vector<8x128xf32>
    %650 = arith.mulf %643, %649 : vector<8x128xf32>
    %651 = arith.addf %626, %650 : vector<8x128xf32>
    %c89 = arith.constant 89 : index
    %652 = memref.load %arg3[%c89] : memref<128xf32, #tpu.memory_space<smem>>
    %653 = vector.broadcast %652 : f32 to vector<8x128xf32>
    %654 = arith.mulf %643, %653 : vector<8x128xf32>
    %655 = arith.addf %630, %654 : vector<8x128xf32>
    %c121 = arith.constant 121 : index
    %656 = memref.load %arg3[%c121] : memref<128xf32, #tpu.memory_space<smem>>
    %657 = vector.broadcast %656 : f32 to vector<8x128xf32>
    %658 = arith.mulf %643, %657 : vector<8x128xf32>
    %659 = arith.addf %634, %658 : vector<8x128xf32>
    %c52_77 = arith.constant 52 : index
    %660 = memref.load %arg2[%c52_77] : memref<64xf32, #tpu.memory_space<smem>>
    %661 = vector.broadcast %660 : f32 to vector<8x128xf32>
    %662 = arith.mulf %1, %661 : vector<8x128xf32>
    %c53_78 = arith.constant 53 : index
    %663 = memref.load %arg2[%c53_78] : memref<64xf32, #tpu.memory_space<smem>>
    %664 = vector.broadcast %663 : f32 to vector<8x128xf32>
    %665 = arith.mulf %0, %664 : vector<8x128xf32>
    %666 = arith.addf %662, %665 : vector<8x128xf32>
    %cst_79 = arith.constant 0.000000e+00 : f32
    %667 = vector.broadcast %cst_79 : f32 to vector<8x128xf32>
    %668 = arith.maximumf %666, %667 : vector<8x128xf32>
    %c26_80 = arith.constant 26 : index
    %669 = memref.load %arg3[%c26_80] : memref<128xf32, #tpu.memory_space<smem>>
    %670 = vector.broadcast %669 : f32 to vector<8x128xf32>
    %671 = arith.mulf %668, %670 : vector<8x128xf32>
    %672 = arith.addf %647, %671 : vector<8x128xf32>
    %c58 = arith.constant 58 : index
    %673 = memref.load %arg3[%c58] : memref<128xf32, #tpu.memory_space<smem>>
    %674 = vector.broadcast %673 : f32 to vector<8x128xf32>
    %675 = arith.mulf %668, %674 : vector<8x128xf32>
    %676 = arith.addf %651, %675 : vector<8x128xf32>
    %c90 = arith.constant 90 : index
    %677 = memref.load %arg3[%c90] : memref<128xf32, #tpu.memory_space<smem>>
    %678 = vector.broadcast %677 : f32 to vector<8x128xf32>
    %679 = arith.mulf %668, %678 : vector<8x128xf32>
    %680 = arith.addf %655, %679 : vector<8x128xf32>
    %c122 = arith.constant 122 : index
    %681 = memref.load %arg3[%c122] : memref<128xf32, #tpu.memory_space<smem>>
    %682 = vector.broadcast %681 : f32 to vector<8x128xf32>
    %683 = arith.mulf %668, %682 : vector<8x128xf32>
    %684 = arith.addf %659, %683 : vector<8x128xf32>
    %c54_81 = arith.constant 54 : index
    %685 = memref.load %arg2[%c54_81] : memref<64xf32, #tpu.memory_space<smem>>
    %686 = vector.broadcast %685 : f32 to vector<8x128xf32>
    %687 = arith.mulf %1, %686 : vector<8x128xf32>
    %c55_82 = arith.constant 55 : index
    %688 = memref.load %arg2[%c55_82] : memref<64xf32, #tpu.memory_space<smem>>
    %689 = vector.broadcast %688 : f32 to vector<8x128xf32>
    %690 = arith.mulf %0, %689 : vector<8x128xf32>
    %691 = arith.addf %687, %690 : vector<8x128xf32>
    %cst_83 = arith.constant 0.000000e+00 : f32
    %692 = vector.broadcast %cst_83 : f32 to vector<8x128xf32>
    %693 = arith.maximumf %691, %692 : vector<8x128xf32>
    %c27_84 = arith.constant 27 : index
    %694 = memref.load %arg3[%c27_84] : memref<128xf32, #tpu.memory_space<smem>>
    %695 = vector.broadcast %694 : f32 to vector<8x128xf32>
    %696 = arith.mulf %693, %695 : vector<8x128xf32>
    %697 = arith.addf %672, %696 : vector<8x128xf32>
    %c59 = arith.constant 59 : index
    %698 = memref.load %arg3[%c59] : memref<128xf32, #tpu.memory_space<smem>>
    %699 = vector.broadcast %698 : f32 to vector<8x128xf32>
    %700 = arith.mulf %693, %699 : vector<8x128xf32>
    %701 = arith.addf %676, %700 : vector<8x128xf32>
    %c91 = arith.constant 91 : index
    %702 = memref.load %arg3[%c91] : memref<128xf32, #tpu.memory_space<smem>>
    %703 = vector.broadcast %702 : f32 to vector<8x128xf32>
    %704 = arith.mulf %693, %703 : vector<8x128xf32>
    %705 = arith.addf %680, %704 : vector<8x128xf32>
    %c123 = arith.constant 123 : index
    %706 = memref.load %arg3[%c123] : memref<128xf32, #tpu.memory_space<smem>>
    %707 = vector.broadcast %706 : f32 to vector<8x128xf32>
    %708 = arith.mulf %693, %707 : vector<8x128xf32>
    %709 = arith.addf %684, %708 : vector<8x128xf32>
    %c56_85 = arith.constant 56 : index
    %710 = memref.load %arg2[%c56_85] : memref<64xf32, #tpu.memory_space<smem>>
    %711 = vector.broadcast %710 : f32 to vector<8x128xf32>
    %712 = arith.mulf %1, %711 : vector<8x128xf32>
    %c57_86 = arith.constant 57 : index
    %713 = memref.load %arg2[%c57_86] : memref<64xf32, #tpu.memory_space<smem>>
    %714 = vector.broadcast %713 : f32 to vector<8x128xf32>
    %715 = arith.mulf %0, %714 : vector<8x128xf32>
    %716 = arith.addf %712, %715 : vector<8x128xf32>
    %cst_87 = arith.constant 0.000000e+00 : f32
    %717 = vector.broadcast %cst_87 : f32 to vector<8x128xf32>
    %718 = arith.maximumf %716, %717 : vector<8x128xf32>
    %c28_88 = arith.constant 28 : index
    %719 = memref.load %arg3[%c28_88] : memref<128xf32, #tpu.memory_space<smem>>
    %720 = vector.broadcast %719 : f32 to vector<8x128xf32>
    %721 = arith.mulf %718, %720 : vector<8x128xf32>
    %722 = arith.addf %697, %721 : vector<8x128xf32>
    %c60 = arith.constant 60 : index
    %723 = memref.load %arg3[%c60] : memref<128xf32, #tpu.memory_space<smem>>
    %724 = vector.broadcast %723 : f32 to vector<8x128xf32>
    %725 = arith.mulf %718, %724 : vector<8x128xf32>
    %726 = arith.addf %701, %725 : vector<8x128xf32>
    %c92 = arith.constant 92 : index
    %727 = memref.load %arg3[%c92] : memref<128xf32, #tpu.memory_space<smem>>
    %728 = vector.broadcast %727 : f32 to vector<8x128xf32>
    %729 = arith.mulf %718, %728 : vector<8x128xf32>
    %730 = arith.addf %705, %729 : vector<8x128xf32>
    %c124 = arith.constant 124 : index
    %731 = memref.load %arg3[%c124] : memref<128xf32, #tpu.memory_space<smem>>
    %732 = vector.broadcast %731 : f32 to vector<8x128xf32>
    %733 = arith.mulf %718, %732 : vector<8x128xf32>
    %734 = arith.addf %709, %733 : vector<8x128xf32>
    %c58_89 = arith.constant 58 : index
    %735 = memref.load %arg2[%c58_89] : memref<64xf32, #tpu.memory_space<smem>>
    %736 = vector.broadcast %735 : f32 to vector<8x128xf32>
    %737 = arith.mulf %1, %736 : vector<8x128xf32>
    %c59_90 = arith.constant 59 : index
    %738 = memref.load %arg2[%c59_90] : memref<64xf32, #tpu.memory_space<smem>>
    %739 = vector.broadcast %738 : f32 to vector<8x128xf32>
    %740 = arith.mulf %0, %739 : vector<8x128xf32>
    %741 = arith.addf %737, %740 : vector<8x128xf32>
    %cst_91 = arith.constant 0.000000e+00 : f32
    %742 = vector.broadcast %cst_91 : f32 to vector<8x128xf32>
    %743 = arith.maximumf %741, %742 : vector<8x128xf32>
    %c29_92 = arith.constant 29 : index
    %744 = memref.load %arg3[%c29_92] : memref<128xf32, #tpu.memory_space<smem>>
    %745 = vector.broadcast %744 : f32 to vector<8x128xf32>
    %746 = arith.mulf %743, %745 : vector<8x128xf32>
    %747 = arith.addf %722, %746 : vector<8x128xf32>
    %c61 = arith.constant 61 : index
    %748 = memref.load %arg3[%c61] : memref<128xf32, #tpu.memory_space<smem>>
    %749 = vector.broadcast %748 : f32 to vector<8x128xf32>
    %750 = arith.mulf %743, %749 : vector<8x128xf32>
    %751 = arith.addf %726, %750 : vector<8x128xf32>
    %c93 = arith.constant 93 : index
    %752 = memref.load %arg3[%c93] : memref<128xf32, #tpu.memory_space<smem>>
    %753 = vector.broadcast %752 : f32 to vector<8x128xf32>
    %754 = arith.mulf %743, %753 : vector<8x128xf32>
    %755 = arith.addf %730, %754 : vector<8x128xf32>
    %c125 = arith.constant 125 : index
    %756 = memref.load %arg3[%c125] : memref<128xf32, #tpu.memory_space<smem>>
    %757 = vector.broadcast %756 : f32 to vector<8x128xf32>
    %758 = arith.mulf %743, %757 : vector<8x128xf32>
    %759 = arith.addf %734, %758 : vector<8x128xf32>
    %c60_93 = arith.constant 60 : index
    %760 = memref.load %arg2[%c60_93] : memref<64xf32, #tpu.memory_space<smem>>
    %761 = vector.broadcast %760 : f32 to vector<8x128xf32>
    %762 = arith.mulf %1, %761 : vector<8x128xf32>
    %c61_94 = arith.constant 61 : index
    %763 = memref.load %arg2[%c61_94] : memref<64xf32, #tpu.memory_space<smem>>
    %764 = vector.broadcast %763 : f32 to vector<8x128xf32>
    %765 = arith.mulf %0, %764 : vector<8x128xf32>
    %766 = arith.addf %762, %765 : vector<8x128xf32>
    %cst_95 = arith.constant 0.000000e+00 : f32
    %767 = vector.broadcast %cst_95 : f32 to vector<8x128xf32>
    %768 = arith.maximumf %766, %767 : vector<8x128xf32>
    %c30_96 = arith.constant 30 : index
    %769 = memref.load %arg3[%c30_96] : memref<128xf32, #tpu.memory_space<smem>>
    %770 = vector.broadcast %769 : f32 to vector<8x128xf32>
    %771 = arith.mulf %768, %770 : vector<8x128xf32>
    %772 = arith.addf %747, %771 : vector<8x128xf32>
    %c62 = arith.constant 62 : index
    %773 = memref.load %arg3[%c62] : memref<128xf32, #tpu.memory_space<smem>>
    %774 = vector.broadcast %773 : f32 to vector<8x128xf32>
    %775 = arith.mulf %768, %774 : vector<8x128xf32>
    %776 = arith.addf %751, %775 : vector<8x128xf32>
    %c94 = arith.constant 94 : index
    %777 = memref.load %arg3[%c94] : memref<128xf32, #tpu.memory_space<smem>>
    %778 = vector.broadcast %777 : f32 to vector<8x128xf32>
    %779 = arith.mulf %768, %778 : vector<8x128xf32>
    %780 = arith.addf %755, %779 : vector<8x128xf32>
    %c126 = arith.constant 126 : index
    %781 = memref.load %arg3[%c126] : memref<128xf32, #tpu.memory_space<smem>>
    %782 = vector.broadcast %781 : f32 to vector<8x128xf32>
    %783 = arith.mulf %768, %782 : vector<8x128xf32>
    %784 = arith.addf %759, %783 : vector<8x128xf32>
    %c62_97 = arith.constant 62 : index
    %785 = memref.load %arg2[%c62_97] : memref<64xf32, #tpu.memory_space<smem>>
    %786 = vector.broadcast %785 : f32 to vector<8x128xf32>
    %787 = arith.mulf %1, %786 : vector<8x128xf32>
    %c63 = arith.constant 63 : index
    %788 = memref.load %arg2[%c63] : memref<64xf32, #tpu.memory_space<smem>>
    %789 = vector.broadcast %788 : f32 to vector<8x128xf32>
    %790 = arith.mulf %0, %789 : vector<8x128xf32>
    %791 = arith.addf %787, %790 : vector<8x128xf32>
    %cst_98 = arith.constant 0.000000e+00 : f32
    %792 = vector.broadcast %cst_98 : f32 to vector<8x128xf32>
    %793 = arith.maximumf %791, %792 : vector<8x128xf32>
    %c31_99 = arith.constant 31 : index
    %794 = memref.load %arg3[%c31_99] : memref<128xf32, #tpu.memory_space<smem>>
    %795 = vector.broadcast %794 : f32 to vector<8x128xf32>
    %796 = arith.mulf %793, %795 : vector<8x128xf32>
    %797 = arith.addf %772, %796 : vector<8x128xf32>
    %c63_100 = arith.constant 63 : index
    %798 = memref.load %arg3[%c63_100] : memref<128xf32, #tpu.memory_space<smem>>
    %799 = vector.broadcast %798 : f32 to vector<8x128xf32>
    %800 = arith.mulf %793, %799 : vector<8x128xf32>
    %801 = arith.addf %776, %800 : vector<8x128xf32>
    %c95 = arith.constant 95 : index
    %802 = memref.load %arg3[%c95] : memref<128xf32, #tpu.memory_space<smem>>
    %803 = vector.broadcast %802 : f32 to vector<8x128xf32>
    %804 = arith.mulf %793, %803 : vector<8x128xf32>
    %805 = arith.addf %780, %804 : vector<8x128xf32>
    %c127 = arith.constant 127 : index
    %806 = memref.load %arg3[%c127] : memref<128xf32, #tpu.memory_space<smem>>
    %807 = vector.broadcast %806 : f32 to vector<8x128xf32>
    %808 = arith.mulf %793, %807 : vector<8x128xf32>
    %809 = arith.addf %784, %808 : vector<8x128xf32>
    %c0_101 = arith.constant 0 : index
    %c0_102 = arith.constant 0 : index
    %c0_103 = arith.constant 0 : index
    %810 = vector.load %arg5[%c0_101, %c0_102, %c0_103] : memref<4x8x128xf32, #tpu.memory_space<vmem>>, vector<1x8x128xf32>
    %811 = vector.shape_cast %810 : vector<1x8x128xf32> to vector<8x128xf32>
    %812 = vector.shape_cast %797 : vector<8x128xf32> to vector<1x8x128xf32>
    tpu.vector_store %arg5[%c0_101, %c0_102, %c0_103], %812 {strides = array<i32>} : memref<4x8x128xf32, #tpu.memory_space<vmem>>, vector<1x8x128xf32>,
    %c1_104 = arith.constant 1 : index
    %c0_105 = arith.constant 0 : index
    %c0_106 = arith.constant 0 : index
    %813 = vector.load %arg5[%c1_104, %c0_105, %c0_106] : memref<4x8x128xf32, #tpu.memory_space<vmem>>, vector<1x8x128xf32>
    %814 = vector.shape_cast %813 : vector<1x8x128xf32> to vector<8x128xf32>
    %815 = vector.shape_cast %801 : vector<8x128xf32> to vector<1x8x128xf32>
    tpu.vector_store %arg5[%c1_104, %c0_105, %c0_106], %815 {strides = array<i32>} : memref<4x8x128xf32, #tpu.memory_space<vmem>>, vector<1x8x128xf32>,
    %c2_107 = arith.constant 2 : index
    %c0_108 = arith.constant 0 : index
    %c0_109 = arith.constant 0 : index
    %816 = vector.load %arg5[%c2_107, %c0_108, %c0_109] : memref<4x8x128xf32, #tpu.memory_space<vmem>>, vector<1x8x128xf32>
    %817 = vector.shape_cast %816 : vector<1x8x128xf32> to vector<8x128xf32>
    %818 = vector.shape_cast %805 : vector<8x128xf32> to vector<1x8x128xf32>
    tpu.vector_store %arg5[%c2_107, %c0_108, %c0_109], %818 {strides = array<i32>} : memref<4x8x128xf32, #tpu.memory_space<vmem>>, vector<1x8x128xf32>,
    %c3_110 = arith.constant 3 : index
    %c0_111 = arith.constant 0 : index
    %c0_112 = arith.constant 0 : index
    %819 = vector.load %arg5[%c3_110, %c0_111, %c0_112] : memref<4x8x128xf32, #tpu.memory_space<vmem>>, vector<1x8x128xf32>
    %820 = vector.shape_cast %819 : vector<1x8x128xf32> to vector<8x128xf32>
    %821 = vector.shape_cast %809 : vector<8x128xf32> to vector<1x8x128xf32>
    tpu.vector_store %arg5[%c3_110, %c0_111, %c0_112], %821 {strides = array<i32>} : memref<4x8x128xf32, #tpu.memory_space<vmem>>, vector<1x8x128xf32>,
    return
  }
  func.func @transform_0(%arg0: i32) -> (i32, i32) {
    %c0_i32 = arith.constant 0 : i32
    %c0_i32_0 = arith.constant 0 : i32
    return %arg0, %c0_i32 : i32, i32
  }
  func.func @transform_1(%arg0: i32) -> i32 {
    %c0_i32 = arith.constant 0 : i32
    %c0_i32_0 = arith.constant 0 : i32
    return %c0_i32 : i32
  }
  func.func @transform_2(%arg0: i32) -> i32 {
    %c0_i32 = arith.constant 0 : i32
    %c0_i32_0 = arith.constant 0 : i32
    return %c0_i32 : i32
  }
  func.func @transform_3(%arg0: i32) -> i32 {
    %c0_i32 = arith.constant 0 : i32
    %c0_i32_0 = arith.constant 0 : i32
    return %c0_i32 : i32
  }
  func.func @transform_4(%arg0: i32) -> (i32, i32, i32) {
    %c0_i32 = arith.constant 0 : i32
    %c0_i32_0 = arith.constant 0 : i32
    %c0_i32_1 = arith.constant 0 : i32
    return %c0_i32, %arg0, %c0_i32_0 : i32, i32, i32
  }
}

</mosaic_0001>

<bundles_post_ra>
// kernel: net_for_polynomials.1
= control target key start
LH: loop header
LB: loop body
LE: loop exit
PB: predicated region body
PF: predicated region fallthrough
CT: control target
= control target key end

     0   :  { %s1766_s0 = inlined_call_operand.vmem [shape: f32[8,128], index: 0, kind: input, shape index: {}]   ;;  %s1767_s1 = inlined_call_operand.vmem [shape: f32[64], index: 1, kind: input, shape index: {}]   ;;  %s1768_s2 = inlined_call_operand.vmem [shape: f32[128], index: 2, kind: input, shape index: {}]   ;;  %s1769_s3 = inlined_call_operand.vmem [shape: f32[4], index: 3, kind: input, shape index: {}]   ;;  %s1770_s4 = inlined_call_operand.vmem [shape: f32[4,8,128], index: 4, kind: output, shape index: {}]  }
   0x1   :  { %1773 = sst [smem:[#allocation19_spill]] %s1766_s0 }
   0x2   :  { %1774 = sst [smem:[#allocation20_spill]] %s1770_s4 }
   0x3   :  { %9 = vsyncpa [#allocation3], 0 }
   0x4   :  { %10 = vsyncpa [#allocation5], 0  ;;  %s29_s17 = sshll.u32 %s1768_s2, 4  ;;  %s19_s20 = sshll.u32 %s1767_s1, 4  ;;  %s30_s17 = int_to_ptr.vmem [resolvable:$true] %s29_s17  ;;  %s20_s20 = int_to_ptr.vmem [resolvable:$true] %s19_s20 }
   0x5   :  { %s1044_s21 = scalar_lea.vmem %s30_s17, 16  ;;  %p1049_p1 = scmp.lt.s32.totalorder %s30_s17, %s30_s17 }
   0x6   :  { %p1045_p0 = scmp.ne.s32.totalorder %s30_s17, %s1044_s21  ;;  %p1050_p2 = scmp.lt.s32.totalorder %s1044_s21, %s1044_s21 }
   0x8   :  { %p1051_p3 = por %p1050_p2, %p1049_p1 }
   0xa   :  { %p1052_p4 = pnand %p1051_p3, %p1045_p0 }
   0xc   :  { %1055 = shalt.err (!%p1052_p4)
}
   0xd   :  { %s1084_s22 = smov [#allocation4]   ;;  %s1056_s23 = scalar_lea.vmem %s20_s20, 16 }
   0xe   :  { %32 = dma.vmem_to_smem %s30_s17, 16, %s1084_s22, [#allocation5]  }
   0xf   :  { %p1057_p5 = scmp.ne.s32.totalorder %s20_s20, %s1056_s23  ;;  %p1061_p6 = scmp.lt.s32.totalorder %s20_s20, %s20_s20 }
  0x10   :  { %p1062_p7 = scmp.lt.s32.totalorder %s1056_s23, %s1056_s23 }
  0x12   :  { %p1063_p8 = por %p1062_p7, %p1061_p6 }
  0x14   :  { %p1064_p9 = pnand %p1063_p8, %p1057_p5 }
  0x16   :  { %1067 = shalt.err (!%p1064_p9)
}
  0x17   :  { %s1085_s2 = smov [#allocation2]   ;;  %s39_s25 = sshll.u32 %s1769_s3, 4  ;;  %s40_s25 = int_to_ptr.vmem [resolvable:$true] %s39_s25 }
  0x18   :  { %22 = dma.vmem_to_smem %s20_s20, 16, %s1085_s2, [#allocation3]  }
  0x19   :  { %s1068_s26 = scalar_lea.vmem %s40_s25, 16  ;;  %p1073_p11 = scmp.lt.s32.totalorder %s40_s25, %s40_s25 }
  0x1a   :  { %p1069_p10 = scmp.ne.s32.totalorder %s40_s25, %s1068_s26  ;;  %p1074_p12 = scmp.lt.s32.totalorder %s1068_s26, %s1068_s26 }
  0x1c   :  { %p1075_p13 = por %p1074_p12, %p1073_p11 }
  0x1e   :  { %p1076_p0 = pnand %p1075_p13, %p1069_p10 }
  0x20   :  { %1079 = shalt.err (!%p1076_p0)
}
  0x21   :  { %s1086_s27 = smov [#allocation6]  }
  0x22   :  { %42 = dma.vmem_to_smem %s40_s25, 16, %s1086_s27, [#allocation5]  }
  0x23   :  { %1080 = dma.done.wait [#allocation3], 16  }
  0x24   :  { %1081 = vsyncadd [#allocation3], 4294967280 }
  0x25   :  { %1082 = dma.done.wait [#allocation5], 32  }
  0x26   :  { %1083 = vsyncadd [#allocation5], 4294967264 }
  0x27   :  { %52 = sfence }
  0x28   :  { %s1121_s28 = sld [smem:[#allocation6]]  ;;  %v1180_v0 = vld [vmem:[%s1766_s0] sm:$0xff] }
  0x29   :  { %s1123_s29 = sld [smem:[#allocation6 + $0x1]]  ;;  %v1190_v1 = vmul.f32 %v1180_v0, %v1180_v0 }
  0x2a   :  { %s1125_s3 = sld [smem:[#allocation6 + $0x2]] }
  0x2b   :  { %s1127_s30 = sld [smem:[#allocation6 + $0x3]] }
  0x2c   :  { %s1129_s5 = sld [smem:[#allocation2]] }
  0x2d   :  { %s1131_s6 = sld [smem:[#allocation2 + $0x1]] }
  0x2e   :  { %s1133_s7 = sld [smem:[#allocation4]]  ;;  %v56_v24 = vstv %s1121_s28 }
  0x2f   :  { %s1135_s8 = sld [smem:[#allocation4 + $0x20]]  ;;  %v58_v25 = vstv %s1123_s29 }
  0x30   :  { %s1137_s9 = sld [smem:[#allocation4 + $0x40]]  ;;  %v60_v32 = vstv %s1125_s3 }
  0x31   :  { %s1139_s10 = sld [smem:[#allocation4 + $0x60]]  ;;  %v62_v33 = vstv %s1127_s30 }
  0x32   :  { %s1141_s11 = sld [smem:[#allocation2 + $0x2]]  ;;  %v64_v2 = vstv %s1129_s5 }
  0x33   :  { %s1143_s12 = sld [smem:[#allocation2 + $0x3]]  ;;  %v67_v3 = vstv %s1131_s6  ;;  %v65_v4 = vmul.f32 %v64_v2, %v1190_v1 }
  0x34   :  { %s1145_s13 = sld [smem:[#allocation4 + $0x1]]  ;;  %v68_v5 = vmul.f32 %v67_v3, %v1180_v0  ;;  %v72_v14 = vstv %s1133_s7 }
  0x35   :  { %s1147_s14 = sld [smem:[#allocation4 + $0x21]]  ;;  %v76_v15 = vstv %s1135_s8 }
  0x36   :  { %s1149_s15 = sld [smem:[#allocation4 + $0x41]]  ;;  %v69_v8 = vadd.f32 %v68_v5, %v65_v4  ;;  %v80_v19 = vstv %s1137_s9 }
  0x37   :  { %s1151_s16 = sld [smem:[#allocation4 + $0x61]]  ;;  %v84_v26 = vstv %s1139_s10 }
  0x38   :  { %s1153_s17 = sld [smem:[#allocation2 + $0x4]]  ;;  %v88_v6 = vstv %s1141_s11  ;;  %v70_v13 = vmax.f32 %v69_v8, 0.0 }
  0x39   :  { %s1155_s18 = sld [smem:[#allocation2 + $0x5]]  ;;  %v91_v7 = vstv %s1143_s12  ;;  %v89_v9 = vmul.f32 %v88_v6, %v1190_v1 }
  0x3a   :  { %s1157_s19 = sld [smem:[#allocation4 + $0x2]]  ;;  %v92_v10 = vmul.f32 %v91_v7, %v1180_v0  ;;  %v73_v20 = vmul.f32 %v72_v14, %v70_v13  ;;  %v77_v21 = vmul.f32 %v76_v15, %v70_v13  ;;  %v81_v28 = vmul.f32 %v80_v19, %v70_v13 }
  0x3b   :  { %s1159_s20 = sld [smem:[#allocation4 + $0x22]]  ;;  %v96_v29 = vstv %s1145_s13  ;;  %v100_v30 = vstv %s1147_s14  ;;  %v85_v38 = vmul.f32 %v84_v26, %v70_v13 }
  0x3c   :  { %s1161_s21 = sld [smem:[#allocation4 + $0x42]]  ;;  %v93_v16 = vadd.f32 %v92_v10, %v89_v9  ;;  %v74_v36 = vadd.f32 %v73_v20, %v56_v24  ;;  %v78_v37 = vadd.f32 %v77_v21, %v58_v25  ;;  %v104_v39 = vstv %s1149_s15 }
  0x3d   :  { %s1163_s22 = sld [smem:[#allocation4 + $0x62]]  ;;  %v82_v44 = vadd.f32 %v81_v28, %v60_v32  ;;  %v108_v45 = vstv %s1151_s16  ;;  %v86_v51 = vadd.f32 %v85_v38, %v62_v33 }
  0x3e   :  { %s1165_s23 = sld [smem:[#allocation2 + $0x6]]  ;;  %v112_v11 = vstv %s1153_s17  ;;  %v94_v27 = vmax.f32 %v93_v16, 0.0 }
  0x3f   :  { %s1167_s2 = sld [smem:[#allocation2 + $0x7]]  ;;  %v115_v12 = vstv %s1155_s18  ;;  %v113_v17 = vmul.f32 %v112_v11, %v1190_v1 }
  0x40   :  { %s1169_s1 = sld [smem:[#allocation4 + $0x3]]  ;;  %v116_v18 = vmul.f32 %v115_v12, %v1180_v0  ;;  %v97_v40 = vmul.f32 %v96_v29, %v94_v27  ;;  %v101_v41 = vmul.f32 %v100_v30, %v94_v27  ;;  %v105_v47 = vmul.f32 %v104_v39, %v94_v27 }
  0x41   :  { %1775 = sst [smem:[#allocation9_spill]] %s1159_s20  ;;  %v120_v48 = vstv %s1157_s19  ;;  %v109_v56 = vmul.f32 %v108_v45, %v94_v27 }
  0x42   :  { %1776 = sst [smem:[#allocation10_spill]] %s1161_s21  ;;  %v117_v31 = vadd.f32 %v116_v18, %v113_v17  ;;  %v98_v54 = vadd.f32 %v97_v40, %v74_v36  ;;  %v102_v55 = vadd.f32 %v101_v41, %v78_v37  ;;  %v106_v62 = vadd.f32 %v105_v47, %v82_v44 }
  0x43   :  { %1777 = sst [smem:[#allocation11_spill]] %s1163_s22  ;;  %v110_v7 = vadd.f32 %v109_v56, %v86_v51 }
  0x44   :  { %s1171_s24 = sld [smem:[#allocation4 + $0x23]]  ;;  %v136_v22 = vstv %s1165_s23  ;;  %v118_v46 = vmax.f32 %v117_v31, 0.0 }
  0x45   :  { %s1173_s25 = sld [smem:[#allocation4 + $0x43]]  ;;  %v139_v23 = vstv %s1167_s2  ;;  %v137_v34 = vmul.f32 %v136_v22, %v1190_v1 }
  0x46   :  { %s1175_s26 = sld [smem:[#allocation4 + $0x63]]  ;;  %v140_v35 = vmul.f32 %v139_v23, %v1180_v0  ;;  %v121_v58 = vmul.f32 %v120_v48, %v118_v46  ;;  %v144_v4 = vstv %s1169_s1 }
  0x47   :  { %s1182_s22 = sld [smem:[#allocation2 + $0x8]] }
  0x48   :  { %s1184_s21 = sld [smem:[#allocation2 + $0x9]]  ;;  %v141_v50 = vadd.f32 %v140_v35, %v137_v34  ;;  %v122_v10 = vadd.f32 %v121_v58, %v98_v54 }
  0x49   :  { %s1186_s20 = sld [smem:[#allocation4 + $0x4]] }
  0x4a   :  { %s1198_s4 = sld [smem:[#allocation4 + $0x64]]  ;;  %v142_v2 = vmax.f32 %v141_v50, 0.0  ;;  %v148_v5 = vstv %s1171_s24 }
  0x4b   :  { %1778 = sst [smem:[#allocation12_spill]] %s1173_s25 }
  0x4c   :  { %1779 = sst [smem:[#allocation13_spill]] %s1175_s26  ;;  %v145_v14 = vmul.f32 %v144_v4, %v142_v2  ;;  %v149_v15 = vmul.f32 %v148_v5, %v142_v2 }
  0x4d   :  { %s1192_s25 = sld [smem:[#allocation4 + $0x24]]  ;;  %v160_v42 = vstv %s1182_s22 }
  0x4e   :  { %s1196_s26 = sld [smem:[#allocation4 + $0x44]]  ;;  %v163_v43 = vstv %s1184_s21  ;;  %v161_v52 = vmul.f32 %v160_v42, %v1190_v1  ;;  %v146_v29 = vadd.f32 %v145_v14, %v122_v10 }
  0x4f   :  { %1780 = sst [smem:[#allocation14_spill]] %s1186_s20  ;;  %v164_v53 = vmul.f32 %v163_v43, %v1180_v0 }
  0x50   :  { %1783 = sst [smem:[#allocation17_spill]] %s1198_s4 }
  0x51   :  { %s1200_s27 = sld [smem:[#allocation2 + $0xa]]  ;;  %v165_v6 = vadd.f32 %v164_v53, %v161_v52 }
  0x52   :  { %s1204_s0 = sld [smem:[#allocation2 + $0xb]] }
  0x53   :  { %1781 = sst [smem:[#allocation15_spill]] %s1192_s25  ;;  %v166_v20 = vmax.f32 %v165_v6, 0.0 }
  0x54   :  { %1782 = sst [smem:[#allocation16_spill]] %s1196_s26 }
  0x55   :  { %s1206_s20 = sld [smem:[#allocation4 + $0x5]] }
  0x56   :  { %s1210_s5 = sld [smem:[#allocation4 + $0x25]] }
  0x57   :  { %s1212_s6 = sld [smem:[#allocation4 + $0x45]]  ;;  %v184_v60 = vstv %s1200_s27 }
  0x58   :  { %s1214_s4 = sld [smem:[#allocation4 + $0x65]]  ;;  %v187_v61 = vstv %s1204_s0  ;;  %v185_v8 = vmul.f32 %v184_v60, %v1190_v1 }
  0x59   :  { %s1218_s26 = sld [smem:[#allocation2 + $0xc]]  ;;  %v188_v9 = vmul.f32 %v187_v61, %v1180_v0 }
  0x5a   :  { %s1220_s25 = sld [smem:[#allocation2 + $0xd]] }
  0x5b   :  { %s1224_s11 = sld [smem:[#allocation4 + $0x6]]  ;;  %v189_v24 = vadd.f32 %v188_v9, %v185_v8  ;;  %v192_v40 = vstv %s1206_s20 }
  0x5c   :  { %s1226_s12 = sld [smem:[#allocation4 + $0x26]]  ;;  %v196_v41 = vstv %s1210_s5 }
  0x5d   :  { %s1234_s17 = sld [smem:[#allocation4 + $0x66]]  ;;  %v190_v39 = vmax.f32 %v189_v24, 0.0  ;;  %v200_v43 = vstv %s1212_s6 }
  0x5e   :  { %1784 = sst [smem:[#allocation18_spill]] %s1214_s4 }
  0x5f   :  { %s1230_s4 = sld [smem:[#allocation4 + $0x46]]  ;;  %v208_v16 = vstv %s1218_s26  ;;  %v193_v51 = vmul.f32 %v192_v40, %v190_v39  ;;  %v197_v52 = vmul.f32 %v196_v41, %v190_v39  ;;  %v201_v54 = vmul.f32 %v200_v43, %v190_v39 }
  0x60   :  { %s1237_s18 = sld [smem:[#allocation2 + $0xe]]  ;;  %v211_v17 = vstv %s1220_s25  ;;  %v209_v26 = vmul.f32 %v208_v16, %v1190_v1 }
  0x61   :  { %s1241_s7 = sld [smem:[#allocation2 + $0xf]]  ;;  %v212_v27 = vmul.f32 %v211_v17, %v1180_v0  ;;  %v216_v58 = vstv %s1224_s11 }
  0x62   :  { %s1246_s8 = sld [smem:[#allocation4 + $0x7]] }
  0x63   :  { %s1250_s9 = sld [smem:[#allocation4 + $0x27]]  ;;  %v213_v42 = vadd.f32 %v212_v27, %v209_v26  ;;  %v228_v9 = vstv %s1234_s17 }
  0x64   :  { %s1256_s28 = sld [smem:[#allocation4 + $0x47]] }
  0x65   :  { %s1785_s29 = sld [smem:[#allocation9_spill]] }
  0x66   :  { %s1259_s10 = sld [smem:[#allocation4 + $0x67]]  ;;  %v232_v34 = vstv %s1237_s18 }
  0x67   :  { %s1263_s3 = sld [smem:[#allocation2 + $0x10]]  ;;  %v235_v35 = vstv %s1241_s7  ;;  %v233_v44 = vmul.f32 %v232_v34, %v1190_v1 }
  0x68   :  { %s1786_s30 = sld [smem:[#allocation10_spill]]  ;;  %v236_v45 = vmul.f32 %v235_v35, %v1180_v0 }
  0x69   :  { %s1266_s13 = sld [smem:[#allocation2 + $0x11]]  ;;  %v244_v17 = vstv %s1250_s9 }
  0x6a   :  { %s1270_s14 = sld [smem:[#allocation4 + $0x8]]  ;;  %v237_v60 = vadd.f32 %v236_v45, %v233_v44 }
  0x6b   :  { %v124_v49 = vstv %s1785_s29  ;;  %s1787_s15 = sld [smem:[#allocation11_spill]] }
  0x6c   :  { %s1274_s21 = sld [smem:[#allocation4 + $0x28]]  ;;  %v125_v59 = vmul.f32 %v124_v49, %v118_v46  ;;  %v252_v26 = vstv %s1259_s10 }
  0x6d   :  { %s1277_s16 = sld [smem:[#allocation4 + $0x48]]  ;;  %v256_v56 = vstv %s1263_s3 }
  0x6e   :  { %v128_v57 = vstv %s1786_s30  ;;  %s1281_s19 = sld [smem:[#allocation4 + $0x68]]  ;;  %v126_v11 = vadd.f32 %v125_v59, %v102_v55  ;;  %v214_v55 = vmax.f32 %v213_v42, 0.0  ;;  %v220_v59 = vstv %s1226_s12 }
  0x6f   :  { %s1789_s22 = sld [smem:[#allocation12_spill]]  ;;  %v129_v3 = vmul.f32 %v128_v57, %v118_v46  ;;  %v259_v57 = vstv %s1266_s13  ;;  %v257_v4 = vmul.f32 %v256_v56, %v1190_v1 }
  0x70   :  { %s1284_s23 = sld [smem:[#allocation2 + $0x12]]  ;;  %v150_v30 = vadd.f32 %v149_v15, %v126_v11  ;;  %v260_v5 = vmul.f32 %v259_v57, %v1180_v0  ;;  %v221_v8 = vmul.f32 %v220_v59, %v214_v55  ;;  %v238_v11 = vmax.f32 %v237_v60, 0.0 }
  0x71   :  { %v132_v63 = vstv %s1787_s15  ;;  %s1288_s2 = sld [smem:[#allocation2 + $0x13]]  ;;  %v130_v18 = vadd.f32 %v129_v3, %v106_v62  ;;  %v240_v15 = vstv %s1246_s8  ;;  %v229_v16 = vmul.f32 %v228_v9, %v214_v55 }
  0x72   :  { %s1790_s29 = sld [smem:[#allocation13_spill]]  ;;  %v133_v12 = vmul.f32 %v132_v63, %v118_v46  ;;  %v224_v63 = vstv %s1230_s4  ;;  %v245_v27 = vmul.f32 %v244_v17, %v238_v11  ;;  %v264_v34 = vstv %s1270_s14 }
  0x73   :  { %s1292_s0 = sld [smem:[#allocation4 + $0x9]]  ;;  %v225_v10 = vmul.f32 %v224_v63, %v214_v55  ;;  %v268_v35 = vstv %s1274_s21 }
  0x74   :  { %1788 = sst [smem:[#allocation9_spill]] %s1281_s19  ;;  %v134_v28 = vadd.f32 %v133_v12, %v110_v7  ;;  %v217_v7 = vmul.f32 %v216_v58, %v214_v55 }
  0x75   :  { %s1791_s27 = sld [smem:[#allocation14_spill]]  ;;  %v152_v13 = vstv %s1789_s22 }
  0x76   :  { %s1792_s30 = sld [smem:[#allocation15_spill]]  ;;  %v153_v21 = vmul.f32 %v152_v13, %v142_v2  ;;  %v280_v12 = vstv %s1284_s23 }
  0x77   :  { %s1793_s1 = sld [smem:[#allocation16_spill]]  ;;  %v283_v13 = vstv %s1288_s2 }
  0x78   :  { %s1295_s15 = sld [smem:[#allocation4 + $0x29]]  ;;  %v156_v19 = vstv %s1790_s29  ;;  %v154_v36 = vadd.f32 %v153_v21, %v130_v18  ;;  %v248_v18 = vstv %s1256_s28  ;;  %v281_v21 = vmul.f32 %v280_v12, %v1190_v1 }
  0x79   :  { %s1299_s24 = sld [smem:[#allocation4 + $0x49]]  ;;  %v157_v31 = vmul.f32 %v156_v19, %v142_v2  ;;  %v261_v19 = vadd.f32 %v260_v5, %v257_v4 }
  0x7a   :  { %s1302_s19 = sld [smem:[#allocation4 + $0x69]] }
  0x7b   :  { %v168_v22 = vstv %s1791_s27  ;;  %s1306_s22 = sld [smem:[#allocation2 + $0x14]]  ;;  %v158_v46 = vadd.f32 %v157_v31, %v134_v28  ;;  %v249_v28 = vmul.f32 %v248_v18, %v238_v11 }
  0x7c   :  { %v172_v23 = vstv %s1792_s30  ;;  %s1311_s25 = sld [smem:[#allocation2 + $0x15]]  ;;  %v169_v32 = vmul.f32 %v168_v22, %v166_v20  ;;  %v284_v22 = vmul.f32 %v283_v13, %v1180_v0 }
  0x7d   :  { %v176_v25 = vstv %s1793_s1  ;;  %s1313_s26 = sld [smem:[#allocation4 + $0xa]]  ;;  %v173_v33 = vmul.f32 %v172_v23, %v166_v20 }
  0x7e   :  { %1794 = sst [smem:[#allocation10_spill]] %s1295_s15  ;;  %v177_v37 = vmul.f32 %v176_v25, %v166_v20  ;;  %v170_v47 = vadd.f32 %v169_v32, %v146_v29  ;;  %v241_v25 = vmul.f32 %v240_v15, %v238_v11  ;;  %v262_v32 = vmax.f32 %v261_v19, 0.0 }
  0x7f   :  { %s1795_s15 = sld [smem:[#allocation17_spill]]  ;;  %v174_v48 = vadd.f32 %v173_v33, %v150_v30  ;;  %v253_v33 = vmul.f32 %v252_v26, %v238_v11  ;;  %v296_v55 = vstv %s1299_s24 }
  0x80   :  { %s1317_s29 = sld [smem:[#allocation4 + $0x2a]]  ;;  %v178_v50 = vadd.f32 %v177_v37, %v154_v36  ;;  %v194_v2 = vadd.f32 %v193_v51, %v170_v47  ;;  %v285_v36 = vadd.f32 %v284_v22, %v281_v21  ;;  %v272_v37 = vstv %s1277_s16 }
  0x81   :  { %s1320_s27 = sld [smem:[#allocation4 + $0x4a]]  ;;  %v198_v3 = vadd.f32 %v197_v52, %v174_v48  ;;  %v304_v29 = vstv %s1306_s22  ;;  %v265_v44 = vmul.f32 %v264_v34, %v262_v32  ;;  %v269_v45 = vmul.f32 %v268_v35, %v262_v32 }
  0x82   :  { %s1796_s30 = sld [smem:[#allocation18_spill]]  ;;  %v202_v6 = vadd.f32 %v201_v54, %v178_v50  ;;  %v307_v30 = vstv %s1311_s25  ;;  %v286_v51 = vmax.f32 %v285_v36, 0.0  ;;  %v288_v52 = vstv %s1292_s0 }
  0x83   :  { %s1324_s1 = sld [smem:[#allocation4 + $0x6a]]  ;;  %v222_v23 = vadd.f32 %v221_v8, %v198_v3  ;;  %v308_v40 = vmul.f32 %v307_v30, %v1180_v0  ;;  %v300_v56 = vstv %s1302_s19  ;;  %v312_v4 = vstv %s1313_s26 }
  0x84   :  { %s1329_s18 = sld [smem:[#allocation2 + $0x16]]  ;;  %v226_v24 = vadd.f32 %v225_v10, %v202_v6  ;;  %v289_v3 = vmul.f32 %v288_v52, %v286_v51  ;;  %v297_v6 = vmul.f32 %v296_v55, %v286_v51 }
  0x85   :  { %v180_v38 = vstv %s1795_s15  ;;  %s1331_s20 = sld [smem:[#allocation2 + $0x17]]  ;;  %v246_v42 = vadd.f32 %v245_v27, %v222_v23 }
  0x86   :  { %v181_v49 = vmul.f32 %v180_v38, %v166_v20  ;;  %s1334_s5 = sld [smem:[#allocation4 + $0xb]]  ;;  %v218_v20 = vadd.f32 %v217_v7, %v194_v2  ;;  %v250_v43 = vadd.f32 %v249_v28, %v226_v24  ;;  %v301_v7 = vmul.f32 %v300_v56, %v286_v51 }
  0x87   :  { %s1338_s6 = sld [smem:[#allocation4 + $0x2b]]  ;;  %v270_v60 = vadd.f32 %v269_v45, %v246_v42  ;;  %v316_v9 = vstv %s1317_s29 }
  0x88   :  { %v204_v53 = vstv %s1796_s30  ;;  %s1342_s7 = sld [smem:[#allocation4 + $0x4b]]  ;;  %v182_v61 = vadd.f32 %v181_v49, %v158_v46  ;;  %v242_v41 = vadd.f32 %v241_v25, %v218_v20  ;;  %v273_v49 = vmul.f32 %v272_v37, %v262_v32 }
  0x89   :  { %v205_v62 = vmul.f32 %v204_v53, %v190_v39  ;;  %s1345_s15 = sld [smem:[#allocation4 + $0x6b]]  ;;  %v305_v39 = vmul.f32 %v304_v29, %v1190_v1  ;;  %v324_v20 = vstv %s1324_s1 }
  0x8a   :  { %s1349_s11 = sld [smem:[#allocation2 + $0x18]]  ;;  %v328_v46 = vstv %s1329_s18  ;;  %v266_v59 = vadd.f32 %v265_v44, %v242_v41  ;;  %v274_v63 = vadd.f32 %v273_v49, %v250_v43 }
  0x8b   :  { %s1352_s12 = sld [smem:[#allocation2 + $0x19]]  ;;  %v206_v14 = vadd.f32 %v205_v62, %v182_v61  ;;  %v331_v47 = vstv %s1331_s20  ;;  %v309_v54 = vadd.f32 %v308_v40, %v305_v39  ;;  %v329_v57 = vmul.f32 %v328_v46, %v1190_v1 }
  0x8c   :  { %s1356_s4 = sld [smem:[#allocation4 + $0xc]]  ;;  %v332_v58 = vmul.f32 %v331_v47, %v1180_v0  ;;  %v290_v13 = vadd.f32 %v289_v3, %v266_v59  ;;  %v298_v21 = vadd.f32 %v297_v6, %v274_v63  ;;  %v336_v26 = vstv %s1334_s5 }
  0x8d   :  { %s1359_s3 = sld [smem:[#allocation4 + $0x2c]]  ;;  %v230_v31 = vadd.f32 %v229_v16, %v206_v14  ;;  %v310_v8 = vmax.f32 %v309_v54, 0.0  ;;  %v320_v14 = vstv %s1320_s27  ;;  %v340_v30 = vstv %s1338_s6 }
  0x8e   :  { %s1363_s17 = sld [smem:[#allocation4 + $0x4c]]  ;;  %v333_v10 = vadd.f32 %v332_v58, %v329_v57  ;;  %v344_v35 = vstv %s1342_s7 }
  0x8f   :  { %s1367_s13 = sld [smem:[#allocation4 + $0x6c]]  ;;  %v254_v48 = vadd.f32 %v253_v33, %v230_v31  ;;  %v313_v18 = vmul.f32 %v312_v4, %v310_v8  ;;  %v317_v19 = vmul.f32 %v316_v9, %v310_v8  ;;  %v321_v25 = vmul.f32 %v320_v14, %v310_v8 }
  0x90   :  { %s1797_s8 = sld [smem:[#allocation9_spill]]  ;;  %v352_v61 = vstv %s1349_s11  ;;  %v334_v23 = vmax.f32 %v333_v10, 0.0  ;;  %v325_v29 = vmul.f32 %v324_v20, %v310_v8  ;;  %v348_v37 = vstv %s1345_s15 }
  0x91   :  { %s1370_s9 = sld [smem:[#allocation2 + $0x1a]]  ;;  %v355_v62 = vstv %s1352_s12  ;;  %v353_v11 = vmul.f32 %v352_v61, %v1190_v1  ;;  %v314_v33 = vadd.f32 %v313_v18, %v290_v13  ;;  %v322_v44 = vadd.f32 %v321_v25, %v298_v21 }
  0x92   :  { %s1374_s28 = sld [smem:[#allocation2 + $0x1b]]  ;;  %v356_v12 = vmul.f32 %v355_v62, %v1180_v0  ;;  %v337_v36 = vmul.f32 %v336_v26, %v334_v23  ;;  %v360_v39 = vstv %s1356_s4  ;;  %v341_v40 = vmul.f32 %v340_v30, %v334_v23 }
  0x93   :  { %s1376_s23 = sld [smem:[#allocation4 + $0xd]]  ;;  %v345_v46 = vmul.f32 %v344_v35, %v334_v23  ;;  %v349_v47 = vmul.f32 %v348_v37, %v334_v23 }
  0x94   :  { %s1380_s10 = sld [smem:[#allocation4 + $0x2d]]  ;;  %v357_v24 = vadd.f32 %v356_v12, %v353_v11 }
  0x95   :  { %s1386_s2 = sld [smem:[#allocation4 + $0x4d]]  ;;  %v372_v55 = vstv %s1367_s13  ;;  %v346_v62 = vadd.f32 %v345_v46, %v322_v44 }
  0x96   :  { %v276_v38 = vstv %s1797_s8  ;;  %s1798_s22 = sld [smem:[#allocation10_spill]] }
  0x97   :  { %s1388_s14 = sld [smem:[#allocation4 + $0x6d]]  ;;  %v277_v50 = vmul.f32 %v276_v38, %v262_v32  ;;  %v376_v15 = vstv %s1370_s9  ;;  %v358_v38 = vmax.f32 %v357_v24, 0.0 }
  0x98   :  { %s1392_s21 = sld [smem:[#allocation2 + $0x1c]]  ;;  %v379_v16 = vstv %s1374_s28  ;;  %v377_v27 = vmul.f32 %v376_v15, %v1190_v1 }
  0x99   :  { %s1394_s16 = sld [smem:[#allocation2 + $0x1d]]  ;;  %v278_v2 = vadd.f32 %v277_v50, %v254_v48  ;;  %v380_v28 = vmul.f32 %v379_v16, %v1180_v0  ;;  %v364_v48 = vstv %s1359_s3  ;;  %v361_v52 = vmul.f32 %v360_v39, %v358_v38 }
  0x9a   :  { %s1398_s25 = sld [smem:[#allocation4 + $0xe]]  ;;  %v365_v58 = vmul.f32 %v364_v48, %v358_v38  ;;  %v384_v59 = vstv %s1376_s23  ;;  %v388_v3 = vstv %s1380_s10 }
  0x9b   :  { %s1404_s30 = sld [smem:[#allocation4 + $0x2e]]  ;;  %v302_v22 = vadd.f32 %v301_v7, %v278_v2  ;;  %v381_v41 = vadd.f32 %v380_v28, %v377_v27  ;;  %v392_v9 = vstv %s1386_s2 }
  0x9c   :  { %v292_v53 = vstv %s1798_s22  ;;  %s1408_s18 = sld [smem:[#allocation4 + $0x4e]] }
  0x9d   :  { %s1411_s19 = sld [smem:[#allocation4 + $0x6e]]  ;;  %v293_v5 = vmul.f32 %v292_v53, %v286_v51  ;;  %v326_v45 = vadd.f32 %v325_v29, %v302_v22  ;;  %v338_v51 = vadd.f32 %v337_v36, %v314_v33  ;;  %v368_v53 = vstv %s1363_s17 }
  0x9e   :  { %s1413_s0 = sld [smem:[#allocation2 + $0x1e]]  ;;  %v400_v31 = vstv %s1392_s21  ;;  %v382_v56 = vmax.f32 %v381_v41, 0.0  ;;  %v369_v2 = vmul.f32 %v368_v53, %v358_v38  ;;  %v396_v10 = vstv %s1388_s14 }
  0x9f   :  { %s1418_s24 = sld [smem:[#allocation2 + $0x1f]]  ;;  %v294_v17 = vadd.f32 %v293_v5, %v270_v60  ;;  %v403_v32 = vstv %s1394_s16  ;;  %v401_v42 = vmul.f32 %v400_v31, %v1190_v1  ;;  %v350_v63 = vadd.f32 %v349_v47, %v326_v45 }
  0xa0   :  { %s1420_s20 = sld [smem:[#allocation4 + $0xf]]  ;;  %v404_v43 = vmul.f32 %v403_v32, %v1180_v0  ;;  %v362_v4 = vadd.f32 %v361_v52, %v338_v51  ;;  %v373_v5 = vmul.f32 %v372_v55, %v358_v38  ;;  %v385_v8 = vmul.f32 %v384_v59, %v382_v56 }
  0xa1   :  { %s1425_s26 = sld [smem:[#allocation4 + $0x2f]]  ;;  %v318_v34 = vadd.f32 %v317_v19, %v294_v17  ;;  %v389_v13 = vmul.f32 %v388_v3, %v382_v56  ;;  %v408_v14 = vstv %s1398_s25  ;;  %v370_v16 = vadd.f32 %v369_v2, %v346_v62 }
  0xa2   :  { %s1428_s29 = sld [smem:[#allocation4 + $0x4f]]  ;;  %v405_v57 = vadd.f32 %v404_v43, %v401_v42  ;;  %v412_v17 = vstv %s1404_s30  ;;  %v374_v20 = vadd.f32 %v373_v5, %v350_v63  ;;  %v393_v21 = vmul.f32 %v392_v9, %v382_v56 }
  0xa3   :  { %s1430_s11 = sld [smem:[#allocation4 + $0x6f]]  ;;  %v342_v54 = vadd.f32 %v341_v40, %v318_v34  ;;  %v397_v22 = vmul.f32 %v396_v10, %v382_v56  ;;  %v416_v23 = vstv %s1408_s18  ;;  %v386_v24 = vadd.f32 %v385_v8, %v362_v4 }
  0xa4   :  { %s1435_s27 = sld [smem:[#allocation2 + $0x20]]  ;;  %v424_v49 = vstv %s1413_s0  ;;  %v406_v11 = vmax.f32 %v405_v57, 0.0  ;;  %v420_v30 = vstv %s1411_s19  ;;  %v394_v34 = vadd.f32 %v393_v21, %v370_v16 }
  0xa5   :  { %s1440_s1 = sld [smem:[#allocation2 + $0x21]]  ;;  %v427_v50 = vstv %s1418_s24  ;;  %v425_v60 = vmul.f32 %v424_v49, %v1190_v1  ;;  %v366_v12 = vadd.f32 %v365_v58, %v342_v54  ;;  %v398_v38 = vadd.f32 %v397_v22, %v374_v20 }
  0xa6   :  { %s1443_s12 = sld [smem:[#allocation4 + $0x10]]  ;;  %v428_v61 = vmul.f32 %v427_v50, %v1180_v0  ;;  %v409_v25 = vmul.f32 %v408_v14, %v406_v11  ;;  %v413_v29 = vmul.f32 %v412_v17, %v406_v11  ;;  %v432_v32 = vstv %s1420_s20 }
  0xa7   :  { %s1447_s5 = sld [smem:[#allocation4 + $0x30]]  ;;  %v390_v28 = vadd.f32 %v389_v13, %v366_v12  ;;  %v436_v35 = vstv %s1425_s26  ;;  %v417_v40 = vmul.f32 %v416_v23, %v406_v11  ;;  %v421_v41 = vmul.f32 %v420_v30, %v406_v11 }
  0xa8   :  { %s1451_s6 = sld [smem:[#allocation4 + $0x50]]  ;;  %v429_v15 = vadd.f32 %v428_v61, %v425_v60  ;;  %v410_v39 = vadd.f32 %v409_v25, %v386_v24  ;;  %v440_v44 = vstv %s1428_s29 }
  0xa9   :  { %s1453_s7 = sld [smem:[#allocation4 + $0x70]]  ;;  %v414_v42 = vadd.f32 %v413_v29, %v390_v28  ;;  %v444_v45 = vstv %s1430_s11  ;;  %v418_v52 = vadd.f32 %v417_v40, %v394_v34  ;;  %v422_v53 = vadd.f32 %v421_v41, %v398_v38 }
  0xaa   :  { %s1458_s15 = sld [smem:[#allocation2 + $0x22]]  ;;  %v448_v6 = vstv %s1435_s27  ;;  %v430_v31 = vmax.f32 %v429_v15, 0.0 }
  0xab   :  { %s1461_s4 = sld [smem:[#allocation2 + $0x23]]  ;;  %v451_v7 = vstv %s1440_s1  ;;  %v449_v18 = vmul.f32 %v448_v6, %v1190_v1 }
  0xac   :  { %s1464_s8 = sld [smem:[#allocation4 + $0x11]]  ;;  %v452_v19 = vmul.f32 %v451_v7, %v1180_v0  ;;  %v433_v43 = vmul.f32 %v432_v32, %v430_v31  ;;  %v437_v46 = vmul.f32 %v436_v35, %v430_v31  ;;  %v456_v50 = vstv %s1443_s12 }
  0xad   :  { %s1469_s3 = sld [smem:[#allocation4 + $0x31]]  ;;  %v441_v54 = vmul.f32 %v440_v44, %v430_v31  ;;  %v460_v55 = vstv %s1447_s5  ;;  %v445_v56 = vmul.f32 %v444_v45, %v430_v31 }
  0xae   :  { %s1472_s17 = sld [smem:[#allocation4 + $0x51]]  ;;  %v453_v33 = vadd.f32 %v452_v19, %v449_v18  ;;  %v464_v57 = vstv %s1451_s6  ;;  %v434_v60 = vadd.f32 %v433_v43, %v410_v39  ;;  %v438_v61 = vadd.f32 %v437_v46, %v414_v42 }
  0xaf   :  { %s1476_s13 = sld [smem:[#allocation4 + $0x71]]  ;;  %v468_v63 = vstv %s1453_s7  ;;  %v442_v6 = vadd.f32 %v441_v54, %v418_v52  ;;  %v446_v9 = vadd.f32 %v445_v56, %v422_v53 }
  0xb0   :  { %s1480_s9 = sld [smem:[#allocation2 + $0x24]]  ;;  %v472_v26 = vstv %s1458_s15  ;;  %v454_v47 = vmax.f32 %v453_v33, 0.0 }
  0xb1   :  { %s1483_s28 = sld [smem:[#allocation2 + $0x25]]  ;;  %v475_v27 = vstv %s1461_s4  ;;  %v473_v36 = vmul.f32 %v472_v26, %v1190_v1 }
  0xb2   :  { %s1488_s23 = sld [smem:[#allocation4 + $0x12]]  ;;  %v476_v37 = vmul.f32 %v475_v27, %v1180_v0  ;;  %v457_v62 = vmul.f32 %v456_v50, %v454_v47  ;;  %v461_v2 = vmul.f32 %v460_v55, %v454_v47  ;;  %v465_v7 = vmul.f32 %v464_v57, %v454_v47 }
  0xb3   :  { %s1491_s10 = sld [smem:[#allocation4 + $0x32]]  ;;  %v480_v8 = vstv %s1464_s8  ;;  %v484_v10 = vstv %s1469_s3  ;;  %v469_v14 = vmul.f32 %v468_v63, %v454_v47 }
  0xb4   :  { %s1495_s2 = sld [smem:[#allocation4 + $0x52]]  ;;  %v477_v51 = vadd.f32 %v476_v37, %v473_v36  ;;  %v488_v11 = vstv %s1472_s17  ;;  %v458_v13 = vadd.f32 %v457_v62, %v434_v60  ;;  %v462_v17 = vadd.f32 %v461_v2, %v438_v61 }
  0xb5   :  { %s1498_s22 = sld [smem:[#allocation4 + $0x72]]  ;;  %v466_v21 = vadd.f32 %v465_v7, %v442_v6  ;;  %v492_v24 = vstv %s1476_s13  ;;  %v470_v32 = vadd.f32 %v469_v14, %v446_v9 }
  0xb6   :  { %s1501_s14 = sld [smem:[#allocation2 + $0x26]]  ;;  %v496_v48 = vstv %s1480_s9  ;;  %v478_v3 = vmax.f32 %v477_v51, 0.0 }
  0xb7   :  { %s1506_s21 = sld [smem:[#allocation2 + $0x27]]  ;;  %v499_v49 = vstv %s1483_s28  ;;  %v497_v58 = vmul.f32 %v496_v48, %v1190_v1 }
  0xb8   :  { %s1508_s16 = sld [smem:[#allocation4 + $0x13]]  ;;  %v500_v59 = vmul.f32 %v499_v49, %v1180_v0  ;;  %v481_v18 = vmul.f32 %v480_v8, %v478_v3  ;;  %v485_v22 = vmul.f32 %v484_v10, %v478_v3  ;;  %v489_v23 = vmul.f32 %v488_v11, %v478_v3 }
  0xb9   :  { %s1512_s25 = sld [smem:[#allocation4 + $0x33]]  ;;  %v504_v26 = vstv %s1488_s23  ;;  %v508_v27 = vstv %s1491_s10  ;;  %v493_v34 = vmul.f32 %v492_v24, %v478_v3 }
  0xba   :  { %s1516_s30 = sld [smem:[#allocation4 + $0x53]]  ;;  %v501_v12 = vadd.f32 %v500_v59, %v497_v58  ;;  %v512_v28 = vstv %s1495_s2  ;;  %v482_v33 = vadd.f32 %v481_v18, %v458_v13  ;;  %v486_v35 = vadd.f32 %v485_v22, %v462_v17 }
  0xbb   :  { %s1519_s18 = sld [smem:[#allocation4 + $0x73]]  ;;  %v490_v36 = vadd.f32 %v489_v23, %v466_v21  ;;  %v516_v37 = vstv %s1498_s22  ;;  %v494_v48 = vadd.f32 %v493_v34, %v470_v32 }
  0xbc   :  { %s1522_s19 = sld [smem:[#allocation2 + $0x28]]  ;;  %v520_v4 = vstv %s1501_s14  ;;  %v502_v25 = vmax.f32 %v501_v12, 0.0 }
  0xbd   :  { %s1527_s0 = sld [smem:[#allocation2 + $0x29]]  ;;  %v523_v5 = vstv %s1506_s21  ;;  %v521_v15 = vmul.f32 %v520_v4, %v1190_v1 }
  0xbe   :  { %s1530_s24 = sld [smem:[#allocation4 + $0x14]]  ;;  %v524_v16 = vmul.f32 %v523_v5, %v1180_v0  ;;  %v505_v39 = vmul.f32 %v504_v26, %v502_v25  ;;  %v509_v40 = vmul.f32 %v508_v27, %v502_v25  ;;  %v513_v41 = vmul.f32 %v512_v28, %v502_v25 }
  0xbf   :  { %s1534_s20 = sld [smem:[#allocation4 + $0x34]]  ;;  %v528_v45 = vstv %s1508_s16  ;;  %v517_v49 = vmul.f32 %v516_v37, %v502_v25  ;;  %v532_v50 = vstv %s1512_s25 }
  0xc0   :  { %s1537_s26 = sld [smem:[#allocation4 + $0x54]]  ;;  %v525_v29 = vadd.f32 %v524_v16, %v521_v15  ;;  %v536_v51 = vstv %s1516_s30  ;;  %v506_v52 = vadd.f32 %v505_v39, %v482_v33  ;;  %v510_v53 = vadd.f32 %v509_v40, %v486_v35 }
  0xc1   :  { %s1541_s29 = sld [smem:[#allocation4 + $0x74]]  ;;  %v514_v54 = vadd.f32 %v513_v41, %v490_v36  ;;  %v540_v55 = vstv %s1519_s18  ;;  %v518_v4 = vadd.f32 %v517_v49, %v494_v48 }
  0xc2   :  { %s1545_s11 = sld [smem:[#allocation2 + $0x2a]]  ;;  %v544_v19 = vstv %s1522_s19  ;;  %v526_v43 = vmax.f32 %v525_v29, 0.0 }
  0xc3   :  { %v547_v20 = vstv %s1527_s0  ;;  %s1549_s27 = sld [smem:[#allocation2 + $0x2b]]  ;;  %v545_v30 = vmul.f32 %v544_v19, %v1190_v1 }
  0xc4   :  { %s1552_s1 = sld [smem:[#allocation4 + $0x15]]  ;;  %v548_v31 = vmul.f32 %v547_v20, %v1180_v0  ;;  %v529_v56 = vmul.f32 %v528_v45, %v526_v43  ;;  %v552_v58 = vstv %s1530_s24  ;;  %v533_v60 = vmul.f32 %v532_v50, %v526_v43 }
  0xc5   :  { %s1556_s12 = sld [smem:[#allocation4 + $0x35]]  ;;  %v537_v61 = vmul.f32 %v536_v51, %v526_v43  ;;  %v556_v5 = vstv %s1534_s20  ;;  %v541_v7 = vmul.f32 %v540_v55, %v526_v43 }
  0xc6   :  { %s1561_s5 = sld [smem:[#allocation4 + $0x55]]  ;;  %v549_v44 = vadd.f32 %v548_v31, %v545_v30  ;;  %v530_v6 = vadd.f32 %v529_v56, %v506_v52  ;;  %v560_v9 = vstv %s1537_s26  ;;  %v534_v10 = vadd.f32 %v533_v60, %v510_v53 }
  0xc7   :  { %s1563_s6 = sld [smem:[#allocation4 + $0x75]]  ;;  %v538_v11 = vadd.f32 %v537_v61, %v514_v54  ;;  %v564_v12 = vstv %s1541_s29  ;;  %v542_v21 = vadd.f32 %v541_v7, %v518_v4 }
  0xc8   :  { %v568_v38 = vstv %s1545_s11  ;;  %s1567_s7 = sld [smem:[#allocation2 + $0x2c]]  ;;  %v550_v57 = vmax.f32 %v549_v44, 0.0 }
  0xc9   :  { %v571_v42 = vstv %s1549_s27  ;;  %s978_s15 = sld [smem:[#allocation2 + $0x2d]]  ;;  %v569_v46 = vmul.f32 %v568_v38, %v1190_v1 }
  0xca   :  { %s1570_s4 = sld [smem:[#allocation4 + $0x16]]  ;;  %v572_v47 = vmul.f32 %v571_v42, %v1180_v0  ;;  %v553_v8 = vmul.f32 %v552_v58, %v550_v57  ;;  %v576_v14 = vstv %s1552_s1  ;;  %v561_v17 = vmul.f32 %v560_v9, %v550_v57 }
  0xcb   :  { %s1575_s8 = sld [smem:[#allocation4 + $0x36]]  ;;  %v580_v18 = vstv %s1556_s12  ;;  %v565_v23 = vmul.f32 %v564_v12, %v550_v57 }
  0xcc   :  { %s1579_s3 = sld [smem:[#allocation4 + $0x56]]  ;;  %v573_v62 = vadd.f32 %v572_v47, %v569_v46  ;;  %v554_v22 = vadd.f32 %v553_v8, %v530_v6  ;;  %v584_v25 = vstv %s1561_s5  ;;  %v562_v32 = vadd.f32 %v561_v17, %v538_v11 }
  0xcd   :  { %s1582_s17 = sld [smem:[#allocation4 + $0x76]]  ;;  %v588_v26 = vstv %s1563_s6  ;;  %v566_v36 = vadd.f32 %v565_v23, %v542_v21 }
  0xce   :  { %v592_v59 = vstv %s1567_s7  ;;  %s983_s13 = sld [smem:[#allocation2 + $0x2e]]  ;;  %v574_v13 = vmax.f32 %v573_v62, 0.0 }
  0xcf   :  { %v595_v63 = vstv %s978_s15  ;;  %s1586_s9 = sld [smem:[#allocation2 + $0x2f]]  ;;  %v593_v2 = vmul.f32 %v592_v59, %v1190_v1 }
  0xd0   :  { %v596_v3 = vmul.f32 %v595_v63, %v1180_v0  ;;  %s1590_s28 = sld [smem:[#allocation4 + $0x17]]  ;;  %v557_v0 = vmul.f32 %v556_v5, %v550_v57  ;;  %v577_v24 = vmul.f32 %v576_v14, %v574_v13  ;;  %v581_v30 = vmul.f32 %v580_v18, %v574_v13 }
  0xd1   :  { %s1593_s23 = sld [smem:[#allocation4 + $0x37]]  ;;  %v600_v33 = vstv %s1570_s4  ;;  %v604_v34 = vstv %s1575_s8  ;;  %v585_v37 = vmul.f32 %v584_v25, %v574_v13  ;;  %v589_v38 = vmul.f32 %v588_v26, %v574_v13 }
  0xd2   :  { %s1596_s10 = sld [smem:[#allocation4 + $0x57]]  ;;  %v597_v15 = vadd.f32 %v596_v3, %v593_v2  ;;  %v558_v29 = vadd.f32 %v557_v0, %v534_v10  ;;  %v578_v40 = vadd.f32 %v577_v24, %v554_v22  ;;  %v608_v41 = vstv %s1579_s3 }
  0xd3   :  { %s1599_s2 = sld [smem:[#allocation4 + $0x77]]  ;;  %v612_v48 = vstv %s1582_s17  ;;  %v586_v50 = vadd.f32 %v585_v37, %v562_v32  ;;  %v590_v54 = vadd.f32 %v589_v38, %v566_v36 }
  0xd4   :  { %v616_v16 = vstv %s983_s13  ;;  %s1602_s22 = sld [smem:[#allocation2 + $0x30]]  ;;  %v598_v31 = vmax.f32 %v597_v15, 0.0  ;;  %v582_v44 = vadd.f32 %v581_v30, %v558_v29 }
  0xd5   :  { %v617_v19 = vmul.f32 %v616_v16, %v1190_v1  ;;  %v619_v20 = vstv %s1586_s9  ;;  %s1607_s14 = sld [smem:[#allocation2 + $0x31]] }
  0xd6   :  { %s1609_s21 = sld [smem:[#allocation4 + $0x18]]  ;;  %v601_v45 = vmul.f32 %v600_v33, %v598_v31  ;;  %v605_v46 = vmul.f32 %v604_v34, %v598_v31  ;;  %v609_v51 = vmul.f32 %v608_v41, %v598_v31  ;;  %v624_v52 = vstv %s1590_s28 }
  0xd7   :  { %s1799_s30 = sld [smem:[#allocation19_spill]]  ;;  %v628_v55 = vstv %s1593_s23  ;;  %v613_v59 = vmul.f32 %v612_v48, %v598_v31 }
  0xd8   :  { %s1619_s18 = sld [smem:[#allocation4 + $0x38]]  ;;  %v632_v56 = vstv %s1596_s10  ;;  %v602_v57 = vadd.f32 %v601_v45, %v578_v40  ;;  %v606_v58 = vadd.f32 %v605_v46, %v582_v44  ;;  %v610_v3 = vadd.f32 %v609_v51, %v586_v50 }
  0xd9   :  { %s1621_s19 = sld [smem:[#allocation4 + $0x58]]  ;;  %v636_v62 = vstv %s1599_s2  ;;  %v614_v9 = vadd.f32 %v613_v59, %v590_v54 }
  0xda   :  { %s1625_s0 = sld [smem:[#allocation4 + $0x78]]  ;;  %v640_v39 = vstv %s1602_s22 }
  0xdb   :  { %s1628_s24 = sld [smem:[#allocation2 + $0x32]]  ;;  %v641_v42 = vmul.f32 %v640_v39, %v1190_v1  ;;  %v643_v43 = vstv %s1607_s14 }
  0xdc   :  { %s1633_s20 = sld [smem:[#allocation2 + $0x33]]  ;;  %v648_v7 = vstv %s1609_s21 }
  0xdd   :  { %v1616_v27 = vld [vmem:[%s1799_s30] sm:$0xff]  ;;  %s1636_s26 = sld [smem:[#allocation4 + $0x19]] }
  0xde   :  { %v620_v28 = vmul.f32 %v1616_v27, %v619_v20  ;;  %v644_v47 = vmul.f32 %v1616_v27, %v643_v43  ;;  %s1639_s29 = sld [smem:[#allocation4 + $0x39]]  ;;  %v652_v11 = vstv %s1619_s18 }
  0xdf   :  { %s1642_s11 = sld [smem:[#allocation4 + $0x59]]  ;;  %v656_v12 = vstv %s1621_s19 }
  0xe0   :  { %v621_v35 = vadd.f32 %v620_v28, %v617_v19  ;;  %v645_v53 = vadd.f32 %v644_v47, %v641_v42  ;;  %s1646_s27 = sld [smem:[#allocation4 + $0x79]]  ;;  %v660_v0 = vstv %s1625_s0 }
  0xe1   :  { %v664_v60 = vstv %s1628_s24  ;;  %s1001_s1 = sld [smem:[#allocation2 + $0x34]] }
  0xe2   :  { %v622_v49 = vmax.f32 %v621_v35, 0.0  ;;  %v665_v63 = vmul.f32 %v664_v60, %v1190_v1  ;;  %v667_v2 = vstv %s1633_s20  ;;  %s1652_s12 = sld [smem:[#allocation2 + $0x35]]  ;;  %v646_v6 = vmax.f32 %v645_v53, 0.0 }
  0xe3   :  { %s1654_s5 = sld [smem:[#allocation4 + $0x1a]]  ;;  %v668_v8 = vmul.f32 %v1616_v27, %v667_v2  ;;  %v672_v28 = vstv %s1636_s26 }
  0xe4   :  { %v625_v61 = vmul.f32 %v624_v52, %v622_v49  ;;  %v629_v4 = vmul.f32 %v628_v55, %v622_v49  ;;  %v633_v5 = vmul.f32 %v632_v56, %v622_v49  ;;  %s1658_s6 = sld [smem:[#allocation4 + $0x3a]]  ;;  %v637_v10 = vmul.f32 %v636_v62, %v622_v49 }
  0xe5   :  { %s1662_s7 = sld [smem:[#allocation4 + $0x5a]]  ;;  %v669_v14 = vadd.f32 %v668_v8, %v665_v63  ;;  %v649_v17 = vmul.f32 %v648_v7, %v646_v6  ;;  %v653_v19 = vmul.f32 %v652_v11, %v646_v6  ;;  %v657_v20 = vmul.f32 %v656_v12, %v646_v6 }
  0xe6   :  { %v626_v13 = vadd.f32 %v625_v61, %v602_v57  ;;  %s1665_s15 = sld [smem:[#allocation4 + $0x7a]]  ;;  %v630_v15 = vadd.f32 %v629_v4, %v606_v58  ;;  %v634_v16 = vadd.f32 %v633_v5, %v610_v3  ;;  %v638_v23 = vadd.f32 %v637_v10, %v614_v9 }
  0xe7   :  { %v688_v18 = vstv %s1001_s1  ;;  %s1007_s4 = sld [smem:[#allocation2 + $0x36]]  ;;  %v661_v24 = vmul.f32 %v660_v0, %v646_v6  ;;  %v670_v25 = vmax.f32 %v669_v14, 0.0  ;;  %v676_v29 = vstv %s1639_s29 }
  0xe8   :  { %v689_v21 = vmul.f32 %v688_v18, %v1190_v1  ;;  %v691_v22 = vstv %s1652_s12  ;;  %s1669_s8 = sld [smem:[#allocation2 + $0x37]]  ;;  %v680_v30 = vstv %s1642_s11  ;;  %v684_v31 = vstv %s1646_s27 }
  0xe9   :  { %v692_v26 = vmul.f32 %v1616_v27, %v691_v22  ;;  %s1672_s3 = sld [smem:[#allocation4 + $0x1b]]  ;;  %v650_v33 = vadd.f32 %v649_v17, %v626_v13  ;;  %v654_v34 = vadd.f32 %v653_v19, %v630_v15  ;;  %v658_v35 = vadd.f32 %v657_v20, %v634_v16 }
  0xea   :  { %s1676_s17 = sld [smem:[#allocation4 + $0x3b]]  ;;  %v662_v36 = vadd.f32 %v661_v24, %v638_v23  ;;  %v673_v37 = vmul.f32 %v672_v28, %v670_v25  ;;  %v677_v38 = vmul.f32 %v676_v29, %v670_v25  ;;  %v681_v40 = vmul.f32 %v680_v30, %v670_v25 }
  0xeb   :  { %v693_v32 = vadd.f32 %v692_v26, %v689_v21  ;;  %s1680_s13 = sld [smem:[#allocation4 + $0x5b]]  ;;  %v685_v41 = vmul.f32 %v684_v31, %v670_v25  ;;  %v696_v45 = vstv %s1654_s5  ;;  %v700_v46 = vstv %s1658_s6 }
  0xec   :  { %s1682_s9 = sld [smem:[#allocation4 + $0x7b]]  ;;  %v704_v47 = vstv %s1662_s7  ;;  %v674_v49 = vadd.f32 %v673_v37, %v650_v33  ;;  %v708_v50 = vstv %s1665_s15  ;;  %v678_v51 = vadd.f32 %v677_v38, %v654_v34 }
  0xed   :  { %v712_v39 = vstv %s1007_s4  ;;  %s1013_s28 = sld [smem:[#allocation2 + $0x38]]  ;;  %v694_v44 = vmax.f32 %v693_v32, 0.0  ;;  %v682_v52 = vadd.f32 %v681_v40, %v658_v35  ;;  %v686_v53 = vadd.f32 %v685_v41, %v662_v36 }
  0xee   :  { %v713_v42 = vmul.f32 %v712_v39, %v1190_v1  ;;  %v715_v43 = vstv %s1669_s8  ;;  %s1014_s23 = sld [smem:[#allocation2 + $0x39]] }
  0xef   :  { %s1686_s10 = sld [smem:[#allocation4 + $0x1c]]  ;;  %v716_v48 = vmul.f32 %v1616_v27, %v715_v43  ;;  %v697_v55 = vmul.f32 %v696_v45, %v694_v44  ;;  %v701_v56 = vmul.f32 %v700_v46, %v694_v44  ;;  %v705_v57 = vmul.f32 %v704_v47, %v694_v44 }
  0xf0   :  { %s1692_s2 = sld [smem:[#allocation4 + $0x3c]]  ;;  %v709_v59 = vmul.f32 %v708_v50, %v694_v44  ;;  %v720_v63 = vstv %s1672_s3  ;;  %v724_v2 = vstv %s1676_s17 }
  0xf1   :  { %s1695_s22 = sld [smem:[#allocation4 + $0x5c]]  ;;  %v717_v54 = vadd.f32 %v716_v48, %v713_v42  ;;  %v728_v4 = vstv %s1680_s13  ;;  %v698_v6 = vadd.f32 %v697_v55, %v674_v49  ;;  %v702_v7 = vadd.f32 %v701_v56, %v678_v51 }
  0xf2   :  { %s1697_s14 = sld [smem:[#allocation4 + $0x7c]]  ;;  %v732_v5 = vstv %s1682_s9  ;;  %v706_v9 = vadd.f32 %v705_v57, %v682_v52  ;;  %v710_v10 = vadd.f32 %v709_v59, %v686_v53 }
  0xf3   :  { %v736_v58 = vstv %s1013_s28  ;;  %s1019_s21 = sld [smem:[#allocation2 + $0x3a]]  ;;  %v718_v60 = vmax.f32 %v717_v54, 0.0 }
  0xf4   :  { %v737_v61 = vmul.f32 %v736_v58, %v1190_v1  ;;  %v739_v62 = vstv %s1014_s23  ;;  %s1700_s16 = sld [smem:[#allocation2 + $0x3b]] }
  0xf5   :  { %v740_v3 = vmul.f32 %v1616_v27, %v739_v62  ;;  %s1705_s25 = sld [smem:[#allocation4 + $0x1d]]  ;;  %v721_v11 = vmul.f32 %v720_v63, %v718_v60  ;;  %v725_v12 = vmul.f32 %v724_v2, %v718_v60  ;;  %v729_v13 = vmul.f32 %v728_v4, %v718_v60 }
  0xf6   :  { %s1709_s30 = sld [smem:[#allocation4 + $0x3d]]  ;;  %v733_v0 = vmul.f32 %v732_v5, %v718_v60  ;;  %v744_v16 = vstv %s1686_s10  ;;  %v748_v19 = vstv %s1692_s2 }
  0xf7   :  { %v741_v8 = vadd.f32 %v740_v3, %v737_v61  ;;  %s1711_s18 = sld [smem:[#allocation4 + $0x5d]]  ;;  %v752_v20 = vstv %s1695_s22  ;;  %v722_v22 = vadd.f32 %v721_v11, %v698_v6  ;;  %v726_v24 = vadd.f32 %v725_v12, %v702_v7 }
  0xf8   :  { %s1713_s19 = sld [smem:[#allocation4 + $0x7d]]  ;;  %v756_v21 = vstv %s1697_s14  ;;  %v730_v25 = vadd.f32 %v729_v13, %v706_v9  ;;  %v734_v26 = vadd.f32 %v733_v0, %v710_v10 }
  0xf9   :  { %v742_v14 = vmax.f32 %v741_v8, 0.0  ;;  %v760_v15 = vstv %s1019_s21  ;;  %s1025_s0 = sld [smem:[#allocation2 + $0x3c]] }
  0xfa   :  { %v761_v17 = vmul.f32 %v760_v15, %v1190_v1  ;;  %v763_v18 = vstv %s1700_s16  ;;  %s1026_s24 = sld [smem:[#allocation2 + $0x3d]] }
  0xfb   :  { %s1721_s20 = sld [smem:[#allocation4 + $0x1e]]  ;;  %v764_v23 = vmul.f32 %v1616_v27, %v763_v18  ;;  %v745_v28 = vmul.f32 %v744_v16, %v742_v14  ;;  %v749_v29 = vmul.f32 %v748_v19, %v742_v14  ;;  %v753_v30 = vmul.f32 %v752_v20, %v742_v14 }
  0xfc   :  { %s1724_s26 = sld [smem:[#allocation4 + $0x3e]]  ;;  %v757_v31 = vmul.f32 %v756_v21, %v742_v14  ;;  %v768_v33 = vstv %s1705_s25  ;;  %v772_v34 = vstv %s1709_s30 }
  0xfd   :  { %s1726_s29 = sld [smem:[#allocation4 + $0x5e]]  ;;  %v765_v32 = vadd.f32 %v764_v23, %v761_v17  ;;  %v776_v35 = vstv %s1711_s18  ;;  %v746_v41 = vadd.f32 %v745_v28, %v722_v22  ;;  %v750_v43 = vadd.f32 %v749_v29, %v726_v24 }
  0xfe   :  { %s1728_s11 = sld [smem:[#allocation4 + $0x7e]]  ;;  %v780_v38 = vstv %s1713_s19  ;;  %v754_v44 = vadd.f32 %v753_v30, %v730_v25  ;;  %v758_v45 = vadd.f32 %v757_v31, %v734_v26 }
  0xff   :  { %v784_v36 = vstv %s1025_s0  ;;  %s1031_s27 = sld [smem:[#allocation2 + $0x3e]]  ;;  %v766_v37 = vmax.f32 %v765_v32, 0.0 }
 0x100   :  { %v785_v39 = vmul.f32 %v784_v36, %v1190_v1  ;;  %v787_v40 = vstv %s1026_s24  ;;  %s1735_s1 = sld [smem:[#allocation2 + $0x3f]] }
 0x101   :  { %v788_v42 = vmul.f32 %v1616_v27, %v787_v40  ;;  %s1738_s12 = sld [smem:[#allocation4 + $0x1f]]  ;;  %v769_v46 = vmul.f32 %v768_v33, %v766_v37  ;;  %v773_v47 = vmul.f32 %v772_v34, %v766_v37  ;;  %v777_v48 = vmul.f32 %v776_v35, %v766_v37 }
 0x102   :  { %s1740_s5 = sld [smem:[#allocation4 + $0x3f]]  ;;  %v781_v49 = vmul.f32 %v780_v38, %v766_v37  ;;  %v792_v51 = vstv %s1721_s20  ;;  %v796_v52 = vstv %s1724_s26 }
 0x103   :  { %v789_v50 = vadd.f32 %v788_v42, %v785_v39  ;;  %s1742_s6 = sld [smem:[#allocation4 + $0x5f]]  ;;  %v800_v54 = vstv %s1726_s29  ;;  %v770_v57 = vadd.f32 %v769_v46, %v746_v41  ;;  %v774_v60 = vadd.f32 %v773_v47, %v750_v43 }
 0x104   :  { %s1036_s7 = sld [smem:[#allocation4 + $0x7f]]  ;;  %v804_v55 = vstv %s1728_s11  ;;  %v778_v61 = vadd.f32 %v777_v48, %v754_v44  ;;  %v782_v62 = vadd.f32 %v781_v49, %v758_v45 }
 0x105   :  { %v790_v53 = vmax.f32 %v789_v50, 0.0  ;;  %v808_v56 = vstv %s1031_s27  ;;  %s1800_s8 = sld [smem:[#allocation20_spill]] }
 0x106   :  { %v809_v58 = vmul.f32 %v808_v56, %v1190_v1  ;;  %v811_v59 = vstv %s1735_s1 }
 0x107   :  { %v793_v63 = vmul.f32 %v792_v51, %v790_v53  ;;  %v797_v2 = vmul.f32 %v796_v52, %v790_v53  ;;  %v801_v3 = vmul.f32 %v800_v54, %v790_v53  ;;  %v805_v4 = vmul.f32 %v804_v55, %v790_v53 }
 0x108   :  { %v812_v5 = vmul.f32 %v1616_v27, %v811_v59  ;;  %v816_v7 = vstv %s1738_s12  ;;  %v820_v9 = vstv %s1740_s5 }
 0x109   :  { %v794_v8 = vadd.f32 %v793_v63, %v770_v57  ;;  %v824_v10 = vstv %s1742_s6  ;;  %v798_v12 = vadd.f32 %v797_v2, %v774_v60  ;;  %v802_v13 = vadd.f32 %v801_v3, %v778_v61 }
 0x10a   :  { %v813_v6 = vadd.f32 %v812_v5, %v809_v58  ;;  %v828_v11 = vstv %s1036_s7  ;;  %v806_v0 = vadd.f32 %v805_v4, %v782_v62 }
 0x10c   :  { %v814_v1 = vmax.f32 %v813_v6, 0.0 }
 0x10e   :  { %v817_v14 = vmul.f32 %v816_v7, %v814_v1  ;;  %v821_v15 = vmul.f32 %v820_v9, %v814_v1  ;;  %v825_v16 = vmul.f32 %v824_v10, %v814_v1  ;;  %v829_v17 = vmul.f32 %v828_v11, %v814_v1 }
 0x110   :  { %v818_v18 = vadd.f32 %v817_v14, %v794_v8  ;;  %v822_v19 = vadd.f32 %v821_v15, %v798_v12  ;;  %v826_v20 = vadd.f32 %v825_v16, %v802_v13  ;;  %v830_v21 = vadd.f32 %v829_v17, %v806_v0 }
 0x112   :  { %831 = vst [vmem:[%s1800_s8] sm:$0xff] %v818_v18  ;;  %1037 = vst [vmem:[%s1800_s8 + $0x8] sm:$0xff] %v822_v19 }
 0x113   :  { %1038 = vst [vmem:[%s1800_s8 + $0x10] sm:$0xff] %v826_v20  ;;  %1039 = vst [vmem:[%s1800_s8 + $0x18] sm:$0xff] %v830_v21 }
 0x114   :  { %842 = vsyncpa [#allocation3], 1 }
 0x115   :  { %843 = vsyncpa [#allocation5], 1 }

</bundles_post_ra>
